<compile_context>
chip_gen: v6e
topology: v6e:2x2x1
jax: 0.10.0
libtpu: 0.0.40
codegen_flags: <defaults>
</compile_context>

<pallas_src>
import functools

import numpy as np
import jax
import jax.numpy as jnp
from jax.experimental import pallas as pl
from jax.experimental.pallas import tpu as pltpu


def _freq_bands(n_freq, max_freq):
    # Identical constants for kernel and reference; returned as plain Python floats
    # so they become scalar (not array) constants inside the kernel.
    return tuple(float(v) for v in (2.0 ** np.linspace(0.0, float(max_freq), n_freq)))


def _pos_emb_kernel(loc_ref, out_ref, *, freq_bands, half_pi):
    # loc_ref: (3, T) f32, lane-dense.   out_ref: (T, 6*n_freq) f32.
    loc = loc_ref[...]                                              # (3, T)
    # Rows in the exact PyTorch column order: (coord, freq) row-major.
    # Scalar multiplies only -> no captured array constants.
    sin_args = [loc[c:c + 1, :] * f for c in range(3) for f in freq_bands]
    t_sin = jnp.concatenate(sin_args, axis=0)                       # (3*n_freq, T)
    # cos(x) == sin(x + pi/2): one fused, fully dense EUP pass over all rows.
    t_all = jnp.concatenate([t_sin, t_sin + half_pi], axis=0)       # (6*n_freq, T)
    s = jnp.sin(t_all)                                              # (6*n_freq, T)
    # Fold the output transpose into the kernel (XLU is otherwise idle) so the
    # wrapper never re-reads the result from HBM.
    out_ref[...] = jnp.transpose(s, (1, 0))                         # (T, 6*n_freq)


def positional_embedding(loc, feature_dim=24, max_freq=10, tile_n=32768):
    """Pallas equivalent of PositionalEmbedding.forward: (N, 3) -> (N, 6*n_freq)."""
    n_freq = max(feature_dim // (3 * 2), 1)
    out_dim = 3 * 2 * n_freq
    N = int(loc.shape[0])
    assert loc.shape[1] == 3, "loc must be (N, 3)"

    # ---- VMEM-aware tile sizing ------------------------------------------------
    try:
        vmem_cap = int(pltpu.get_tpu_info().vmem_capacity_bytes)
    except Exception:
        vmem_cap = 64 * 1024 * 1024          # conservative (v7x per-core VMEM)
    # Generous per-row VMEM estimate: double-buffered input (8-sublane padded) and
    # output (128-lane padded) blocks + lane-dense temporaries + transpose result.
    bytes_per_row = 2 * 32 + 2 * 512 + 4 * 4 * out_dim + 512
    vmem_tile_cap = max(128, ((vmem_cap // 2) // bytes_per_row) // 128 * 128)

    n128 = pl.cdiv(N, 128) * 128
    tile = min(int(tile_n), vmem_tile_cap, n128)
    if n128 >= 2 * 128:
        # Keep at least 2 grid steps so v7x can shard the "parallel" axis over
        # both TensorCores instead of collapsing mid-size N into one step.
        tile = min(tile, pl.cdiv(pl.cdiv(N, 2), 128) * 128)
    tile = max(128, (tile // 128) * 128)

    grid = (pl.cdiv(N, tile),)
    vmem_limit = int(min(vmem_cap, max(32 << 20, tile * bytes_per_row + (8 << 20))))

    kernel = functools.partial(
        _pos_emb_kernel,
        freq_bands=_freq_bands(n_freq, max_freq),
        half_pi=float(np.pi / 2),
    )

    # Cheap layout plumbing: f32 cast folds into the (N,3)->(3,N) transpose so the
    # kernel gets a lane-dense input (only ~12 B/row of extra HBM traffic).
    loc_t = jnp.asarray(loc, jnp.float32).T                          # (3, N)

    return pl.pallas_call(
        kernel,
        out_shape=jax.ShapeDtypeStruct((N, out_dim), jnp.float32),
        grid=grid,
        in_specs=[pl.BlockSpec((3, tile), lambda i: (0, i))],
        out_specs=pl.BlockSpec((tile, out_dim), lambda i: (i, 0)),
        compiler_params=pltpu.CompilerParams(
            dimension_semantics=("parallel",),
            vmem_limit_bytes=vmem_limit,
        ),
    )(loc_t)


def _reference(loc, feature_dim=24, max_freq=10):
    """Pure-JAX port of the PyTorch forward (verification only)."""
    n_freq = max(feature_dim // (3 * 2), 1)
    fb = jnp.asarray(_freq_bands(n_freq, max_freq), dtype=jnp.float32)
    freq_loc = loc.astype(jnp.float32)[:, :, None] * fb              # (N, 3, n_freq)
    sin_cos = jnp.concatenate((jnp.sin(freq_loc), jnp.cos(freq_loc)), axis=1)
    return sin_cos.reshape(loc.shape[0], 3 * 2 * n_freq)


if __name__ == "__main__":
    key = jax.random.PRNGKey(0)
    N = 1000  # exercises a 2-step grid with a clipped boundary block (tile=512)
    loc = jax.random.uniform(key, (N, 3), dtype=jnp.float32, minval=-1.0, maxval=1.0)

    out = jax.block_until_ready(positional_embedding(loc, feature_dim=24, max_freq=10))
    ref = _reference(loc, feature_dim=24, max_freq=10)

    assert out.shape == (N, 24), out.shape
    # cos rows are sin(t + fl32(pi/2)); with |loc| <= 1 and freqs up to 2**10 the
    # phase-add rounding bounds the error near ~6e-5, so 5e-4 is ample margin yet
    # orders of magnitude tighter than any layout/permutation mistake would produce.
    err = float(jnp.max(jnp.abs(out - ref)))
    assert err < 5e-4, f"max abs error {err}"
    print("KERNEL_OK")
</pallas_src>

<mosaic_0001>
module attributes {stable_mosaic.version = 11 : i64} {
  func.func @_pos_emb_kernel(%arg0: i32, %arg1: memref<3x512xf32, #tpu.memory_space<vmem>>, %arg2: memref<512x24xf32, #tpu.memory_space<vmem>>) attributes {dimension_semantics = [#tpu.dimension_semantics<parallel>], iteration_bounds = array<i64: 2>, scalar_prefetch = 0 : i64, scratch_operands = 0 : i64, tpu.core_type = #tpu.core_type<tc>, window_params = [{transform_indices = @transform_0, window_bounds = array<i64: 3, 512>}, {transform_indices = @transform_1, window_bounds = array<i64: 512, 24>}]} {
    %c0 = arith.constant 0 : index
    %c0_0 = arith.constant 0 : index
    %0 = vector.load %arg1[%c0, %c0_0] : memref<3x512xf32, #tpu.memory_space<vmem>>, vector<3x512xf32>
    %1 = vector.extract_strided_slice %0 {offsets = [0, 0], sizes = [1, 512], strides = [1, 1]} : vector<3x512xf32> to vector<1x512xf32>
    %cst = arith.constant 1.000000e+00 : f32
    %2 = vector.broadcast %cst : f32 to vector<1x512xf32>
    %3 = arith.mulf %1, %2 : vector<1x512xf32>
    %4 = vector.extract_strided_slice %0 {offsets = [0, 0], sizes = [1, 512], strides = [1, 1]} : vector<3x512xf32> to vector<1x512xf32>
    %cst_1 = arith.constant 10.0793686 : f32
    %5 = vector.broadcast %cst_1 : f32 to vector<1x512xf32>
    %6 = arith.mulf %4, %5 : vector<1x512xf32>
    %7 = vector.extract_strided_slice %0 {offsets = [0, 0], sizes = [1, 512], strides = [1, 1]} : vector<3x512xf32> to vector<1x512xf32>
    %cst_2 = arith.constant 101.593666 : f32
    %8 = vector.broadcast %cst_2 : f32 to vector<1x512xf32>
    %9 = arith.mulf %7, %8 : vector<1x512xf32>
    %10 = vector.extract_strided_slice %0 {offsets = [0, 0], sizes = [1, 512], strides = [1, 1]} : vector<3x512xf32> to vector<1x512xf32>
    %cst_3 = arith.constant 1.024000e+03 : f32
    %11 = vector.broadcast %cst_3 : f32 to vector<1x512xf32>
    %12 = arith.mulf %10, %11 : vector<1x512xf32>
    %13 = vector.extract_strided_slice %0 {offsets = [1, 0], sizes = [1, 512], strides = [1, 1]} : vector<3x512xf32> to vector<1x512xf32>
    %cst_4 = arith.constant 1.000000e+00 : f32
    %14 = vector.broadcast %cst_4 : f32 to vector<1x512xf32>
    %15 = arith.mulf %13, %14 : vector<1x512xf32>
    %16 = vector.extract_strided_slice %0 {offsets = [1, 0], sizes = [1, 512], strides = [1, 1]} : vector<3x512xf32> to vector<1x512xf32>
    %cst_5 = arith.constant 10.0793686 : f32
    %17 = vector.broadcast %cst_5 : f32 to vector<1x512xf32>
    %18 = arith.mulf %16, %17 : vector<1x512xf32>
    %19 = vector.extract_strided_slice %0 {offsets = [1, 0], sizes = [1, 512], strides = [1, 1]} : vector<3x512xf32> to vector<1x512xf32>
    %cst_6 = arith.constant 101.593666 : f32
    %20 = vector.broadcast %cst_6 : f32 to vector<1x512xf32>
    %21 = arith.mulf %19, %20 : vector<1x512xf32>
    %22 = vector.extract_strided_slice %0 {offsets = [1, 0], sizes = [1, 512], strides = [1, 1]} : vector<3x512xf32> to vector<1x512xf32>
    %cst_7 = arith.constant 1.024000e+03 : f32
    %23 = vector.broadcast %cst_7 : f32 to vector<1x512xf32>
    %24 = arith.mulf %22, %23 : vector<1x512xf32>
    %25 = vector.extract_strided_slice %0 {offsets = [2, 0], sizes = [1, 512], strides = [1, 1]} : vector<3x512xf32> to vector<1x512xf32>
    %cst_8 = arith.constant 1.000000e+00 : f32
    %26 = vector.broadcast %cst_8 : f32 to vector<1x512xf32>
    %27 = arith.mulf %25, %26 : vector<1x512xf32>
    %28 = vector.extract_strided_slice %0 {offsets = [2, 0], sizes = [1, 512], strides = [1, 1]} : vector<3x512xf32> to vector<1x512xf32>
    %cst_9 = arith.constant 10.0793686 : f32
    %29 = vector.broadcast %cst_9 : f32 to vector<1x512xf32>
    %30 = arith.mulf %28, %29 : vector<1x512xf32>
    %31 = vector.extract_strided_slice %0 {offsets = [2, 0], sizes = [1, 512], strides = [1, 1]} : vector<3x512xf32> to vector<1x512xf32>
    %cst_10 = arith.constant 101.593666 : f32
    %32 = vector.broadcast %cst_10 : f32 to vector<1x512xf32>
    %33 = arith.mulf %31, %32 : vector<1x512xf32>
    %34 = vector.extract_strided_slice %0 {offsets = [2, 0], sizes = [1, 512], strides = [1, 1]} : vector<3x512xf32> to vector<1x512xf32>
    %cst_11 = arith.constant 1.024000e+03 : f32
    %35 = vector.broadcast %cst_11 : f32 to vector<1x512xf32>
    %36 = arith.mulf %34, %35 : vector<1x512xf32>
    %37 = tpu.concatenate %3, %6, %9, %12, %15, %18, %21, %24, %27, %30, %33, %36 in 0 : vector<1x512xf32>, vector<1x512xf32>, vector<1x512xf32>, vector<1x512xf32>, vector<1x512xf32>, vector<1x512xf32>, vector<1x512xf32>, vector<1x512xf32>, vector<1x512xf32>, vector<1x512xf32>, vector<1x512xf32>, vector<1x512xf32> -> vector<12x512xf32>
    %cst_12 = arith.constant 1.57079637 : f32
    %38 = vector.broadcast %cst_12 : f32 to vector<12x512xf32>
    %39 = arith.addf %37, %38 : vector<12x512xf32>
    %40 = tpu.concatenate %37, %39 in 0 : vector<12x512xf32>, vector<12x512xf32> -> vector<24x512xf32>
    %41 = math.sin %40 : vector<24x512xf32>
    %42 = tpu.transpose %41, [1, 0] : vector<24x512xf32> -> vector<512x24xf32>
    %c0_13 = arith.constant 0 : index
    %c0_14 = arith.constant 0 : index
    %43 = vector.load %arg2[%c0_13, %c0_14] : memref<512x24xf32, #tpu.memory_space<vmem>>, vector<512x24xf32>
    tpu.vector_store %arg2[%c0_13, %c0_14], %42 {strides = array<i32>} : memref<512x24xf32, #tpu.memory_space<vmem>>, vector<512x24xf32>,
    return
  }
  func.func @transform_0(%arg0: i32) -> (i32, i32) {
    %c0_i32 = arith.constant 0 : i32
    %c0_i32_0 = arith.constant 0 : i32
    return %c0_i32, %arg0 : i32, i32
  }
  func.func @transform_1(%arg0: i32) -> (i32, i32) {
    %c0_i32 = arith.constant 0 : i32
    %c0_i32_0 = arith.constant 0 : i32
    return %arg0, %c0_i32 : i32, i32
  }
}

</mosaic_0001>

<bundles_post_ra>
// kernel: tpu_custom_call.1
= control target key start
LH: loop header
LB: loop body
LE: loop exit
PB: predicated region body
PF: predicated region fallthrough
CT: control target
= control target key end

     0   :  { %6 = vsyncpa [#allocation3], 0  ;;  %s4492_s0 = inlined_call_operand.hbm [shape: f32[3,1000], index: 0, kind: input, shape index: {}]   ;;  %s4493_s1 = inlined_call_operand.vmem [shape: f32[1000,24], index: 1, kind: output, shape index: {}]  }
   0x1   :  { %8 = vsyncpa [#allocation3 + $0x1], 0  ;;  %s2827_s6 = smov 0   ;;  %s2829_s7 = smov 0  }
   0x2   :  { %s2831_s8 = smov 0   ;;  %s2833_s9 = smov 0  }
   0x3 LB: > { %s2846_s10 = sadd.s32 4294967295, %s2776_s9   ;;  %s2849_s11 = sadd.s32 1, %s2776_s9   ;;  %s2776_s9 = sphi %s2833_s9, %s4544_s9   ;;  %s2772_s8 = sphi %s2831_s8, %s4543_s8   ;;  %s2768_s7 = sphi %s2829_s7, %s4542_s7   ;;  %s2764_s6 = sphi %s2827_s6, %s4541_s6  }
   0x4   : > { %s18_s12 = ssub.s32 %s2776_s9, %s2849_s11  ;;  %s21_s13 = sadd.s32 1, %s2772_s8 }
   0x5   : > { %p19_p0 = scmp.eq.s32.totalorder %s18_s12, 0  ;;  %p28_p1 = scmp.ne.s32.totalorder %s2772_s8, %s2768_s7 }
   0x6   : > { %p29_p2 = scmp.eq.s32.totalorder %s2776_s9, 0  ;;  %p34_p3 = scmp.ne.s32.totalorder %s2768_s7, %s2764_s6 }
   0x7   : > { %s2859_s14 = scalar_select %p19_p0, %s2772_s8, %s21_s13  }
   0x8   : > { %p2861_p4 = por %p29_p2, %p28_p1  ;;  %p35_p5 = scmp.eq.s32.totalorder %s2846_s10, 0 }
   0x9   : > { %p58_p6 = scmp.eq.s32.totalorder %s2846_s10, 1  ;;  %p2530_p8 = scmp.lt.s32.totalorder %s2776_s9, 2 }
   0xa   : > { %p2867_p7 = por %p35_p5, %p34_p3  ;;  %s84_s18 = sand.u32 1, %s2772_s8  }
   0xb   : > { %p2872_p9 = por %p58_p6, %p28_p1  ;;  %s2401_s19 = sshll.u32 %s84_s18, 4 }
   0xc   : > { %s4499_s16 = scalar_select %p2867_p7, 1, 0 }
   0xd   : > { %s4500_s17 = scalar_select %p2872_p9, 1, 0 }
   0xe   : > { %s2472_s20 = sshll.u32 %s2776_s9, 8  ;;  %s88_s24 = scalar_lea.vmem [#allocation2], %s2401_s19 }
   0xf   : > { %s2881_s23 = scalar_lea.hbm %s4492_s0, %s2472_s20  ;;  %s96_s25 = sshll.u32 %s88_s24, 4  ;;  %s2883_s25 = int_to_ptr.vmem [resolvable:$true] %s96_s25 }
  0x10   : > { %p2887_p10 = pnand %p2530_p8, %p2861_p4  ;;  %s85_s27 = scalar_lea.sflag [#allocation3], %s84_s18 }
  0x11   : > { %s2682_s28 = scalar_lea.hbm %s2881_s23, 256  ;;  %s2687_s2 = scalar_lea.hbm %s4492_s0, 512 }
  0x12   : > { %p2683_p13 = scmp.ne.s32.totalorder %s2881_s23, %s2682_s28  ;;  %p2684_p0 = pneg %p2887_p10 }
  0x13   : > { %p2688_p3 = scmp.lt.s32.totalorder %s2881_s23, %s4492_s0  ;;  %p2689_p4 = scmp.lt.s32.totalorder %s2687_s2, %s2682_s28 }
  0x14   : > { %p2685_p1 = pnand %p2684_p0, %p2683_p13 }
  0x15   : > { %p2690_p5 = por %p2689_p4, %p2688_p3 }
  0x16   : > { %p2686_p2 = pneg %p2685_p1 }
  0x18   : > { %p2691_p6 = pnand %p2690_p5, %p2686_p2 }
  0x1a   : > { %2694 = shalt.err (!%p2691_p6)
}
  0x1b   : > { %s2695_s5 = scalar_lea.vmem %s2883_s25, 256  ;;  %s2810_s6 = smov [#allocation2]  }
  0x1c   : > { %p2696_p8 = scmp.ne.s32.totalorder %s2883_s25, %s2695_s5  ;;  %s2700_s12 = sshll.u32 %s2810_s6, 4  ;;  %s2701_s12 = int_to_ptr.vmem [resolvable:$false] %s2700_s12 }
  0x1d   : > { %s2702_s13 = scalar_lea.vmem %s2701_s12, 512  ;;  %p2703_p1 = scmp.lt.s32.totalorder %s2883_s25, %s2701_s12 }
  0x1e   : > { %p2698_p11 = pnand %p2696_p8, %p2684_p0  ;;  %p2704_p12 = scmp.lt.s32.totalorder %s2702_s13, %s2695_s5 }
  0x20   : > { %p2699_p13 = pneg %p2698_p11  ;;  %p2705_p9 = por %p2704_p12, %p2703_p1 }
  0x22   : > { %p2706_p7 = pnand %p2705_p9, %p2699_p13 }
  0x24   : > { %2709 = shalt.err (!%p2706_p7)
}
  0x25   : > { %2529 = dma.hbm_to_vmem [thread:$0]  (!%p2887_p10), %s2881_s23, 256, %s2883_s25, %s85_s27  }
  0x26   : > { %p4502_p2 = scmp.lt.s32.totalorder %s2776_s9, 3  ;;  %p4503_p3 = scmp.ge.s32.totalorder %s2776_s9, 1 }
  0x28   : > { %p102_p0 = pnand %p4503_p3, %p4502_p2 }
  0x29   : > { %s2916_s15 = sand.u32 (!%p102_p0), 1, %s2768_s7   ;;  %p4504_p7 = scmp.ne.s32.totalorder (!%p102_p0), %s4499_s16, 0 }
  0x2a   : > { %105 = sbr.rel (%p102_p0) target bundleno = 662 (0x296), region = 24  ;;  %s2405_s18 = sshll.u32 (!%p102_p0), %s2916_s15, 4 }
  0x2b   : > { %s108_s19 = scalar_lea.sflag (!%p102_p0), [#allocation3], %s2916_s15  ;;  %s2920_s20 = scalar_lea.vmem (!%p102_p0), [#allocation2], %s2405_s18 }
  0x2f   : > { %2759 = dma.done.wait (%p4504_p7), %s108_s19, 256  }
  0x30   : > { %2761 = vsyncadd (%p4504_p7), %s108_s19, 4294967040  ;;  %v145_v0 = vlaneseq  ;;  %vm391_vm0 = vcmask 1040384   ;;  %vm396_vm1 = vcmask 1041408   ;;  %vm401_vm2 = vcmask 1042432   ;;  %v135_v6 = vld [vmem:[%s2920_s20] sm:$0x77] }
  0x31   : > { %vm406_vm3 = vcmask 1043456   ;;  %vm4497_vm4 = vcmask 1044480   ;;  %vm4496_vm5 = vcmask 1045504   ;;  %v137_v8 = vmul.f32 10.079369, %v135_v6  ;;  %s2406_s9 = sshll.u32 %s2916_s15, 9 }
  0x32   : > { %v146_v1 = vshrl.u32 %v145_v0, 7  ;;  %v139_v9 = vmul.f32 101.593666, %v135_v6  ;;  %v2937_v10 = vmul.f32 1024.0, %v135_v6  ;;  %vm4495_vm6 = vcmask 1046528   ;;  %s4062_s16 = scalar_lea.vmem [#allocation4], %s2406_s9  }
  0x33   : > { %p4535_p9 = scmp.ne.s32.totalorder %s4500_s17, 0 }
  0x34   : > { %v2926_v2 = vsub.s32 4, %v146_v1  ;;  %v2928_v3 = vsub.s32 5, %v146_v1  ;;  %v2930_v4 = vsub.s32 0, %v146_v1  ;;  %v2932_v5 = vsub.s32 1, %v146_v1  ;;  %s2456_s21 = sshll.u32 (%p4535_p9), %s2846_s10, 6  ;;  %s2473_s22 = sshll.u32 (%p4535_p9), %s2846_s10, 9 }
  0x35   : > { %v2935_v7 = vsub.s32 6, %v146_v1  ;;  %v2942_v14 = vsub.s32 2, %v146_v1  ;;  %s1927_s23 = ssub.s32 (%p4535_p9), 125, %s2456_s21  ;;  %s4290_s26 = scalar_lea.vmem (%p4535_p9), %s4493_s1, %s2473_s22  }
  0x36   : > { %v152_v11 = vrot.slane %v135_v6, %v2926_v2  ;;  %v238_v12 = vrot.slane %v135_v6, %v2928_v3  ;;  %v148_v13 = vrot.slane %v135_v6, %v2930_v4  ;;  %v174_v15 = vrot.slane %v137_v8, %v2926_v2  ;;  %p1928_p10 = scmp.lt.s32.totalorder (%p4535_p9), %s1927_s23, 64 }
  0x37   : > { %v196_v16 = vrot.slane %v139_v9, %v2926_v2  ;;  %v218_v17 = vrot.slane %v2937_v10, %v2926_v2  ;;  %v234_v18 = vrot.slane %v135_v6, %v2932_v5  ;;  %v258_v19 = vrot.slane %v137_v8, %v2928_v3 }
  0x38   : > { %v170_v20 = vrot.slane %v137_v8, %v2930_v4  ;;  %v192_v21 = vrot.slane %v139_v9, %v2930_v4  ;;  %v318_v22 = vrot.slane %v135_v6, %v2935_v7  ;;  %v278_v23 = vrot.slane %v139_v9, %v2928_v3 }
  0x39   : > { %v298_v24 = vrot.slane %v2937_v10, %v2928_v3  ;;  %v393_v25 = vsel %vm391_vm0, %v152_v11, %v174_v15  ;;  %v214_v26 = vrot.slane %v2937_v10, %v2930_v4  ;;  %v254_v28 = vrot.slane %v137_v8, %v2932_v5 }
  0x3a   : > { %v398_v27 = vsel %vm396_vm1, %v393_v25, %v196_v16  ;;  %v392_v29 = vsel %vm391_vm0, %v148_v13, %v170_v20  ;;  %v338_v30 = vrot.slane %v137_v8, %v2935_v7  ;;  %v274_v32 = vrot.slane %v139_v9, %v2932_v5 }
  0x3b   : > { %v403_v31 = vsel %vm401_vm2, %v398_v27, %v218_v17  ;;  %v397_v33 = vsel %vm396_vm1, %v392_v29, %v192_v21  ;;  %v358_v34 = vrot.slane %v139_v9, %v2935_v7  ;;  %v294_v36 = vrot.slane %v2937_v10, %v2932_v5 }
  0x3c   : > { %v408_v35 = vsel %vm406_vm3, %v403_v31, %v238_v12  ;;  %v402_v37 = vsel %vm401_vm2, %v397_v33, %v214_v26  ;;  %v427_v38 = vsel %vm391_vm0, %v318_v22, %v338_v30  ;;  %v314_v41 = vrot.slane %v135_v6, %v2942_v14 }
  0x3d   : > { %v413_v39 = vsel %vm4497_vm4, %v408_v35, %v258_v19  ;;  %v407_v40 = vsel %vm406_vm3, %v402_v37, %v234_v18  ;;  %v334_v42 = vrot.slane %v137_v8, %v2942_v14  ;;  %v378_v45 = vrot.slane %v2937_v10, %v2935_v7 }
  0x3e   : > { %v418_v43 = vsel %vm4496_vm5, %v413_v39, %v278_v23  ;;  %v412_v44 = vsel %vm4497_vm4, %v407_v40, %v254_v28  ;;  %v431_v48 = vsel %vm396_vm1, %v427_v38, %v358_v34  ;;  %v354_v51 = vrot.slane %v139_v9, %v2942_v14 }
  0x3f   : > { %v2981_v46 = vsel %vm4495_vm6, %v418_v43, %v298_v24  ;;  %v417_v47 = vsel %vm4496_vm5, %v412_v44, %v274_v32  ;;  %v426_v54 = vsel %vm391_vm0, %v314_v41, %v334_v42  ;;  %v2996_v56 = vsel %vm401_vm2, %v431_v48, %v378_v45 }
  0x40   : > { %v582_v49 = vand.u32 2147483647, %v2981_v46  ;;  %v585_v50 = vand.u32 2139095040, %v2981_v46  ;;  %v2989_v52 = vsel %vm4495_vm6, %v417_v47, %v294_v36  ;;  %v2992_v53 = vadd.f32 1.5707964, %v2981_v46 }
  0x41   : > { %v478_v58 = vand.u32 2147483647, %v2989_v52  ;;  %v481_v59 = vand.u32 2139095040, %v2989_v52  ;;  %v374_v62 = vrot.slane %v2937_v10, %v2942_v14  ;;  %v430_v63 = vsel %vm396_vm1, %v426_v54, %v354_v51 }
  0x42   : > { %v586_v55 = vshrl.u32 %v585_v50, 23  ;;  %v589_v57 = vand.u32 8388607, %v582_v49  ;;  %v455_v60 = vrot.slane %v2992_v53, 4  ;;  %v3019_v19 = vadd.f32 1.5707964, %v2989_v52 }
  0x43   : > { %v482_v0 = vshrl.u32 %v481_v59, 23  ;;  %v485_v1 = vand.u32 8388607, %v478_v58  ;;  %v3016_v10 = vsel %vm401_vm2, %v430_v63, %v374_v62  ;;  %v2811_v24 = vmov 683565275  }
  0x44   : > { %v2411_v61 = vadd.s32 4294967169, %v586_v55  ;;  %v3012_v6 = vsel %vm406_vm3, %v2996_v56, %v455_v60  ;;  %v590_v9 = vor.u32 8388608, %v589_v57  ;;  %v2812_v26 = vmov 2475754826  }
  0x45   : > { %v2407_v11 = vadd.s32 4294967169, %v482_v0  ;;  %v486_v12 = vor.u32 8388608, %v485_v1  ;;  %v1001_v13 = vand.u32 2139095040, %v3012_v6  ;;  %v2813_v28 = vmov 2131351028  }
  0x46   : > { %v592_v8 = vadd.s32 1, %v2411_v61  ;;  %v3021_v20 = vshll.u32 %v590_v9, 8  ;;  %v2814_v30 = vmov 2102212464   ;;  %v2815_v32 = vmov 920167782  }
  0x47   : > { %v488_v16 = vadd.s32 1, %v2407_v11  ;;  %v3023_v21 = vshll.u32 %v486_v12, 8  ;;  %v3025_v22 = vshrl.u32 %v1001_v13, 23  ;;  %v2816_v39 = vmov 1326507024  }
  0x48   : > { %vm593_vm7 = vcmp.gt.s32.totalorder %v592_v8, 0 }
  0x49   : > { %v594_v15 = vsel %vm593_vm7, %v592_v8, 0  ;;  %vm489_vm8 = vcmp.gt.s32.totalorder %v488_v16, 0 }
  0x4a   : > { %v595_v17 = vshrl.u32 %v594_v15, 5  ;;  %v596_v18 = vand.u32 31, %v594_v15  ;;  %v490_v44 = vsel %vm489_vm8, %v488_v16, 0 }
  0x4b   : > { %v491_v48 = vshrl.u32 %v490_v44, 5  ;;  %v492_v50 = vand.u32 31, %v490_v44 }
  0x4c   : > { %v597_v23 = vsub.s32 32, %v596_v18  ;;  %v599_v25 = vshll.u32 %v2811_v24, %v596_v18  ;;  %v602_v27 = vshll.u32 %v2812_v26, %v596_v18  ;;  %v605_v29 = vshll.u32 %v2813_v28, %v596_v18 }
  0x4d   : > { %v608_v31 = vshll.u32 %v2814_v30, %v596_v18  ;;  %v611_v33 = vshll.u32 %v2815_v32, %v596_v18  ;;  %vm614_vm9 = vcmp.lt.s32.totalorder %v595_v17, 1  ;;  %vm615_vm10 = vcmp.lt.s32.totalorder %v595_v17, 2 }
  0x4e   : > { %v598_v34 = vshrl.u32 %v2811_v24, %v597_v23  ;;  %v600_v35 = vshrl.u32 %v2812_v26, %v597_v23  ;;  %v603_v36 = vshrl.u32 %v2813_v28, %v597_v23  ;;  %v606_v37 = vshrl.u32 %v2814_v30, %v597_v23 }
  0x4f   : > { %v609_v38 = vshrl.u32 %v2815_v32, %v597_v23  ;;  %v612_v40 = vshrl.u32 %v2816_v39, %v597_v23  ;;  %vm616_vm11 = vcmp.lt.s32.totalorder %v595_v17, 3  ;;  %vm617_vm12 = vcmp.lt.s32.totalorder %v595_v17, 4 }
  0x50   : > { %v601_v41 = vor.u32 %v600_v35, %v599_v25  ;;  %v604_v42 = vor.u32 %v603_v36, %v602_v27  ;;  %v607_v43 = vor.u32 %v606_v37, %v605_v29  ;;  %v493_v63 = vsub.s32 32, %v492_v50 }
  0x51   : > { %v610_v45 = vor.u32 %v609_v38, %v608_v31  ;;  %v613_v47 = vor.u32 %v612_v40, %v611_v33  ;;  %v495_v9 = vshll.u32 %v2811_v24, %v492_v50  ;;  %v498_v29 = vshll.u32 %v2812_v26, %v492_v50 }
  0x52   : > { %v618_v51 = vsel %vm614_vm9, %v598_v34, %v601_v41  ;;  %v619_v54 = vsel %vm617_vm12, %v607_v43, 2102212464  ;;  %v622_v55 = vsel %vm614_vm9, %v601_v41, %v604_v42  ;;  %v626_v57 = vsel %vm614_vm9, %v604_v42, %v607_v43 }
  0x53   : > { %v620_v59 = vsel %vm616_vm11, %v604_v42, %v619_v54  ;;  %v623_v61 = vsel %vm617_vm12, %v610_v45, 920167782  ;;  %v627_v62 = vsel %vm617_vm12, %v613_v47, 1326507024  ;;  %v494_v15 = vshrl.u32 %v2811_v24, %v493_v63 }
  0x54   : > { %v621_v0 = vsel %vm615_vm10, %v618_v51, %v620_v59  ;;  %v624_v1 = vsel %vm616_vm11, %v607_v43, %v623_v61  ;;  %v628_v8 = vsel %vm616_vm11, %v610_v45, %v627_v62  ;;  %v496_v27 = vshrl.u32 %v2812_v26, %v493_v63 }
  0x55   : > { %v625_v11 = vsel %vm615_vm10, %v622_v55, %v624_v1  ;;  %v629_v12 = vsel %vm615_vm10, %v626_v57, %v628_v8  ;;  %v637_v13 = vmul.u32 %v3021_v20, %v621_v0  ;;  %v499_v17 = vshrl.u32 %v2813_v28, %v493_v63 }
  0x56   : > { %v3052_v16 = vmul.u32.u64.low %v3021_v20, %v629_v12  ;;  %v3053_v18 = vmul.u32.u64.high %v3021_v20, %v629_v12, %v3052_v16  ;;  %v3056_v23 = vmul.u32.u64.low %v3021_v20, %v625_v11  ;;  %v3057_v25 = vmul.u32.u64.high %v3021_v20, %v625_v11, %v3056_v23 }
  0x57   : > { %v501_v31 = vshll.u32 %v2813_v28, %v492_v50  ;;  %v502_v33 = vshrl.u32 %v2814_v30, %v493_v63  ;;  %v504_v34 = vshll.u32 %v2814_v30, %v492_v50  ;;  %v505_v35 = vshrl.u32 %v2815_v32, %v493_v63 }
  0x58   : > { %v507_v36 = vshll.u32 %v2815_v32, %v492_v50  ;;  %v497_v37 = vor.u32 %v496_v27, %v495_v9  ;;  %v500_v20 = vor.u32 %v499_v17, %v498_v29  ;;  %v508_v38 = vshrl.u32 %v2816_v39, %v493_v63 }
  0x59   : > { %vm510_vm13 = vcmp.lt.s32.totalorder %v491_v48, 1  ;;  %vm639_vm14 = vc.u32 %v3053_v18, %v3056_v23  ;;  %v640_v40 = vadd.s32 1, %v3057_v25  ;;  %v503_v41 = vor.u32 %v502_v33, %v501_v31 }
  0x5a   : > { %v2427_v42 = vadd.s32 4294967169, %v3025_v22  ;;  %v506_v43 = vor.u32 %v505_v35, %v504_v34  ;;  %v509_v44 = vor.u32 %v508_v38, %v507_v36  ;;  %vm511_vm15 = vcmp.lt.s32.totalorder %v491_v48, 2 }
  0x5b   : > { %vm512_vm7 = vcmp.lt.s32.totalorder %v491_v48, 3  ;;  %v641_v45 = vsel %vm639_vm14, %v640_v40, %v3057_v25  ;;  %vm513_vm8 = vcmp.lt.s32.totalorder %v491_v48, 4  ;;  %v514_v47 = vsel %vm510_vm13, %v494_v15, %v497_v37 }
  0x5c   : > { %v518_v50 = vsel %vm510_vm13, %v497_v37, %v500_v20  ;;  %v642_v51 = vadd.s32 %v641_v45, %v637_v13  ;;  %v515_v54 = vsel %vm513_vm8, %v503_v41, 2102212464  ;;  %v519_v55 = vsel %vm513_vm8, %v506_v43, 920167782 }
  0x5d   : > { %v522_v57 = vsel %vm510_vm13, %v500_v20, %v503_v41  ;;  %v516_v59 = vsel %vm512_vm7, %v500_v20, %v515_v54  ;;  %v520_v61 = vsel %vm512_vm7, %v503_v41, %v519_v55  ;;  %v523_v62 = vsel %vm513_vm8, %v509_v44, 1326507024 }
  0x5e   : > { %v1008_v22 = vadd.s32 1, %v2427_v42  ;;  %v643_v63 = vadd.s32 536870912, %v642_v51  ;;  %v521_v0 = vsel %vm511_vm15, %v518_v50, %v520_v61  ;;  %v524_v1 = vsel %vm512_vm7, %v506_v43, %v523_v62 }
  0x5f   : > { %v998_v8 = vand.u32 2147483647, %v3012_v6  ;;  %v517_v9 = vsel %vm511_vm15, %v514_v47, %v516_v59  ;;  %v525_v11 = vsel %vm511_vm15, %v522_v57, %v524_v1  ;;  %v3096_v33 = vadd.f32 1.5707964, %v2996_v56 }
  0x60   : > { %v3082_v12 = vmul.u32.u64.low %v3023_v21, %v521_v0  ;;  %v3083_v13 = vmul.u32.u64.high %v3023_v21, %v521_v0, %v3082_v12  ;;  %v3086_v15 = vshrl.u32 %v643_v63, 30  ;;  %vm1009_vm9 = vcmp.gt.s32.totalorder %v1008_v22, 0 }
  0x61   : > { %v3089_v16 = vmul.u32.u64.low %v3023_v21, %v525_v11  ;;  %v3090_v25 = vmul.u32.u64.high %v3023_v21, %v525_v11, %v3089_v16  ;;  %v1010_v27 = vsel %vm1009_vm9, %v1008_v22, 0  ;;  %v533_v17 = vmul.u32 %v3023_v21, %v517_v9 }
  0x62   : > { %v645_v29 = vshll.u32 %v3086_v15, 30  ;;  %v1012_v31 = vand.u32 31, %v1010_v27  ;;  %v536_v48 = vadd.s32 1, %v3083_v13  ;;  %v1005_v34 = vand.u32 8388607, %v998_v8 }
  0x63   : > { %v454_v35 = vrot.slane %v3019_v19, 4  ;;  %vm535_vm10 = vc.u32 %v3090_v25, %v3082_v12  ;;  %v460_v40 = vrot.slane %v3096_v33, 4  ;;  %v3106_v56 = vadd.f32 1.5707964, %v3016_v10 }
  0x64   : > { %v646_v36 = vsub.s32 %v642_v51, %v645_v29  ;;  %v537_v37 = vsel %vm535_vm10, %v536_v48, %v3083_v13  ;;  %v1013_v20 = vsub.s32 32, %v1012_v31  ;;  %v1006_v41 = vor.u32 8388608, %v1005_v34 }
  0x65   : > { %v538_v21 = vadd.s32 %v537_v37, %v533_v17  ;;  %v3112_v42 = vsel %vm406_vm3, %v3016_v10, %v454_v35  ;;  %v3114_v45 = vshrl.u32 %v1010_v27, 5  ;;  %v1015_v47 = vshll.u32 %v2811_v24, %v1012_v31 }
  0x66   : > { %v648_v38 = vsub.s32 0, %v646_v36  ;;  %v1016_v50 = vshrl.u32 %v2812_v26, %v1013_v20  ;;  %v1018_v51 = vshll.u32 %v2812_v26, %v1012_v31  ;;  %v1019_v54 = vshrl.u32 %v2813_v28, %v1013_v20 }
  0x67   : > { %v539_v44 = vadd.s32 536870912, %v538_v21  ;;  %v1021_v55 = vshll.u32 %v2813_v28, %v1012_v31  ;;  %v1022_v59 = vshrl.u32 %v2814_v30, %v1013_v20  ;;  %v1024_v10 = vshll.u32 %v2814_v30, %v1012_v31 }
  0x68   : > { %v2412_v43 = vmin.u32 %v648_v38, %v646_v36  ;;  %v1025_v61 = vshrl.u32 %v2815_v32, %v1013_v20  ;;  %v638_v62 = vadd.s32 %v3056_v23, %v3053_v18  ;;  %v1027_v63 = vshll.u32 %v2815_v32, %v1012_v31 }
  0x69   : > { %v3126_v22 = vshrl.u32 %v539_v44, 30  ;;  %v3129_v0 = vshll.u32 %v1006_v41, 8  ;;  %vm584_vm11 = vcmp.lt.s32.totalorder %v2981_v46, 0  ;;  %v668_v9 = vsub.s32 4, %v3086_v15 }
  0x6a   : > { %v650_v57 = vclz %v2412_v43  ;;  %v1028_v11 = vshrl.u32 %v2816_v39, %v1013_v20  ;;  %v897_v13 = vand.u32 2139095040, %v3112_v42  ;;  %v1014_v27 = vshrl.u32 %v2811_v24, %v1013_v20 }
  0x6b   : > { %v541_v16 = vshll.u32 %v3126_v22, 30  ;;  %v1017_v18 = vor.u32 %v1016_v50, %v1015_v47  ;;  %v1020_v23 = vor.u32 %v1019_v54, %v1018_v51  ;;  %v1023_v29 = vor.u32 %v1022_v59, %v1021_v55 }
  0x6c   : > { %v2413_v1 = vadd.s32 4294967294, %v650_v57  ;;  %v1026_v17 = vor.u32 %v1025_v61, %v1024_v10  ;;  %vm1030_vm13 = vcmp.lt.s32.totalorder %v3114_v45, 1  ;;  %v1029_v34 = vor.u32 %v1028_v11, %v1027_v63 }
  0x6d   : > { %v3138_v48 = vsub.s32 %v538_v21, %v541_v16  ;;  %vm1033_vm14 = vcmp.lt.s32.totalorder %v3114_v45, 4  ;;  %vm3143_vm15 = vcmp.le.f32.partialorder %v582_v49, 0.7853982  ;;  %vm1032_vm7 = vcmp.lt.s32.totalorder %v3114_v45, 3 }
  0x6e   : > { %vm2414_vm12 = vcmp.lt.s32.totalorder %v2413_v1, 0  ;;  %vm480_vm8 = vcmp.lt.s32.totalorder %v2989_v52, 0  ;;  %vm1031_vm9 = vcmp.lt.s32.totalorder %v3114_v45, 2  ;;  %v1034_v21 = vsel %vm1030_vm13, %v1014_v27, %v1017_v18 }
  0x6f   : > { %v653_v31 = vsel %vm2414_vm12, 0, %v2413_v1  ;;  %v544_v43 = vsub.s32 0, %v3138_v48  ;;  %v1035_v49 = vsel %vm1033_vm14, %v1023_v29, 2102212464  ;;  %v1039_v50 = vsel %vm1033_vm14, %v1026_v17, 920167782 }
  0x70   : > { %v654_v20 = vsub.s32 32, %v653_v31  ;;  %v655_v38 = vshll.u32 %v646_v36, %v653_v31  ;;  %v658_v41 = vsub.s32 4294967266, %v653_v31  ;;  %v1038_v36 = vsel %vm1030_vm13, %v1017_v18, %v1020_v23 }
  0x71   : > { %v2408_v51 = vmin.u32 %v544_v43, %v3138_v48  ;;  %v1040_v54 = vsel %vm1032_vm7, %v1023_v29, %v1039_v50  ;;  %v1042_v55 = vsel %vm1030_vm13, %v1020_v23, %v1023_v29  ;;  %v1043_v57 = vsel %vm1033_vm14, %v1029_v34, 1326507024 }
  0x72   : > { %v656_v44 = vshrl.u32 %v638_v62, %v654_v20  ;;  %v659_v47 = vadd.s32 127, %v658_v41  ;;  %vm3168_vm10 = vcmp.le.f32.partialorder %v478_v58, 0.7853982  ;;  %v1036_v62 = vsel %vm1032_vm7, %v1020_v23, %v1035_v49 }
  0x73   : > { %v1044_v63 = vsel %vm1032_vm7, %v1026_v17, %v1043_v57  ;;  %v669_v1 = vsel %vm584_vm11, %v668_v9, %v3086_v15  ;;  %v546_v11 = vclz %v2408_v51  ;;  %v1041_v16 = vsel %vm1031_vm9, %v1038_v36, %v1040_v54 }
  0x74   : > { %v657_v59 = vor.u32 %v656_v44, %v655_v38  ;;  %v660_v10 = vshll.u32 %v659_v47, 23  ;;  %v3186_v58 = vsel %vm406_vm3, %v455_v60, %v460_v40  ;;  %v564_v23 = vsub.s32 4, %v3126_v22 }
  0x75   : > { %v1045_v29 = vsel %vm1031_vm9, %v1042_v55, %v1044_v63  ;;  %v2409_v17 = vadd.s32 4294967294, %v546_v11  ;;  %v1037_v15 = vsel %vm1031_vm9, %v1034_v21, %v1036_v62  ;;  %v898_v40 = vshrl.u32 %v897_v13, 23 }
  0x76   : > { %v661_v27 = vor.u32 4788187, %v660_v10  ;;  %v664_v18 = vcvt.s32.f32 %v657_v59  ;;  %v3194_v9 = vmul.u32.u64.low %v3129_v0, %v1045_v29  ;;  %v3195_v31 = vmul.u32.u64.high %v3129_v0, %v1045_v29, %v3194_v9 }
  0x77   : > { %v3198_v53 = vmul.u32.u64.low %v3129_v0, %v1041_v16  ;;  %v3199_v60 = vmul.u32.u64.high %v3129_v0, %v1041_v16, %v3198_v53  ;;  %v671_v34 = vsel %vm3143_vm15, 0, %v669_v1  ;;  %v534_v20 = vadd.s32 %v3082_v12, %v3090_v25 }
  0x78   : > { %v662_v33 = vand.u32 2147483647, %v661_v27  ;;  %vm2410_vm12 = vcmp.lt.s32.totalorder %v2409_v17, 0  ;;  %v894_v45 = vand.u32 2147483647, %v3112_v42  ;;  %v565_v43 = vsel %vm480_vm8, %v564_v23, %v3126_v22 }
  0x79   : > { %v549_v41 = vsel %vm2410_vm12, 0, %v2409_v17  ;;  %v2423_v21 = vadd.s32 4294967169, %v898_v40  ;;  %v1053_v47 = vmul.u32 %v3129_v0, %v1037_v15  ;;  %v675_v50 = vadd.s32 3, %v671_v34 }
  0x7a   : > { %v665_v38 = vmul.f32 %v664_v18, %v662_v33  ;;  %v550_v49 = vsub.s32 32, %v549_v41  ;;  %v551_v44 = vshll.u32 %v3138_v48, %v549_v41  ;;  %v554_v13 = vsub.s32 4294967266, %v549_v41 }
  0x7b   : > { %vm1055_vm13 = vc.u32 %v3195_v31, %v3198_v53  ;;  %v1056_v12 = vadd.s32 1, %v3199_v60  ;;  %v567_v54 = vsel %vm3168_vm10, 0, %v565_v43  ;;  %v904_v55 = vadd.s32 1, %v2423_v21 }
  0x7c   : > { %v666_v36 = vxor.u32 2147483648, %v665_v38  ;;  %v552_v25 = vshrl.u32 %v534_v20, %v550_v49  ;;  %v555_v51 = vadd.s32 127, %v554_v13  ;;  %v901_v0 = vand.u32 8388607, %v894_v45 }
  0x7d   : > { %v1057_v48 = vsel %vm1055_vm13, %v1056_v12, %v3199_v60  ;;  %v1417_v57 = vand.u32 2139095040, %v3186_v58  ;;  %v3224_v1 = vand.u32 3, %v675_v50  ;;  %v571_v11 = vadd.s32 3, %v567_v54 }
  0x7e   : > { %v667_v22 = vsel %vm584_vm11, %v666_v36, %v665_v38  ;;  %v553_v10 = vor.u32 %v552_v25, %v551_v44  ;;  %v556_v62 = vshll.u32 %v555_v51, 23  ;;  %v1058_v63 = vadd.s32 %v1057_v48, %v1053_v47 }
  0x7f   : > { %v670_v59 = vsel %vm3143_vm15, %v2981_v46, %v667_v22  ;;  %vm905_vm14 = vcmp.gt.s32.totalorder %v904_v55, 0  ;;  %v902_v23 = vor.u32 8388608, %v901_v0  ;;  %v1418_v17 = vshrl.u32 %v1417_v57, 23 }
  0x80   : > { %2634 = vcosq.f32 %v670_v59  ;;  %v557_v16 = vor.u32 4788187, %v556_v62  ;;  %v560_v27 = vcvt.s32.f32 %v553_v10  ;;  %v1059_v18 = vadd.s32 536870912, %v1058_v63 }
  0x81   : > { %2636 = vsinq.f32 %v670_v59  ;;  %v906_v29 = vsel %vm905_vm14, %v904_v55, 0  ;;  %v3226_v37 = vand.u32 3, %v571_v11  ;;  %v458_v60 = vrot.slane %v3106_v56, 4 }
  0x82   : > { %v558_v15 = vand.u32 2147483647, %v557_v16  ;;  %v1060_v9 = vshrl.u32 %v1059_v18, 30  ;;  %v908_v33 = vand.u32 31, %v906_v29  ;;  %vm681_vm11 = vcmp.eq.s32.totalorder %v3224_v1, 2 }
  0x83   : > { %vm1000_vm15 = vcmp.lt.s32.totalorder %v3012_v6, 0  ;;  %v1414_v38 = vand.u32 2147483647, %v3186_v58  ;;  %vm678_vm7 = vcmp.eq.s32.totalorder %v3224_v1, 0  ;;  %v3234_v41 = vadd.s32 %v3198_v53, %v3195_v31 }
  0x84   : > { %v561_v40 = vmul.f32 %v560_v27, %v558_v15  ;;  %v1061_v34 = vshll.u32 %v1060_v9, 30  ;;  %v909_v20 = vsub.s32 32, %v908_v33  ;;  %v3236_v43 = vshrl.u32 %v906_v29, 5 }
  0x85   : > { %v3238_v21 = vshll.u32 %v902_v23, 8  ;;  %v2443_v49 = vadd.s32 4294967169, %v1418_v17  ;;  %vm677_vm9 = vcmp.lt.s32.totalorder %v3224_v1, 2  ;;  %v911_v47 = vshll.u32 %v2811_v24, %v908_v33 }
  0x86   : > { %v562_v44 = vxor.u32 2147483648, %v561_v40  ;;  %v3241_v13 = vsub.s32 %v1058_v63, %v1061_v34  ;;  %v914_v36 = vshll.u32 %v2812_v26, %v908_v33  ;;  %vm674_vm12 = vweird.f32 %v2981_v46 }
  0x87   : > { %v912_v50 = vshrl.u32 %v2812_v26, %v909_v20  ;;  %v915_v31 = vshrl.u32 %v2813_v28, %v909_v20  ;;  %v917_v53 = vshll.u32 %v2813_v28, %v908_v33  ;;  %v920_v12 = vshll.u32 %v2814_v30, %v908_v33 }
  0x88   : > { %v563_v25 = vsel %vm480_vm8, %v562_v44, %v561_v40  ;;  %v1064_v51 = vsub.s32 0, %v3241_v13  ;;  %v918_v54 = vshrl.u32 %v2814_v30, %v909_v20  ;;  %v921_v55 = vshrl.u32 %v2815_v32, %v909_v20 }
  0x89   : > { %v566_v22 = vsel %vm3168_vm10, %v2989_v52, %v563_v25  ;;  %v1084_v48 = vsub.s32 4, %v1060_v9  ;;  %v3260_v0 = vand.u32 8388607, %v1414_v38  ;;  %v1424_v57 = vadd.s32 1, %v2443_v49 }
  0x8a   : > { %2638 = vcosq.f32 %v566_v22  ;;  %v2428_v59 = vmin.u32 %v1064_v51, %v3241_v13  ;;  %v913_v10 = vor.u32 %v912_v50, %v911_v47  ;;  %v916_v62 = vor.u32 %v915_v31, %v914_v36 }
  0x8b   : > { %2640 = vsinq.f32 %v566_v22  ;;  %v922_v63 = vor.u32 %v921_v55, %v920_v12  ;;  %v923_v11 = vshll.u32 %v2815_v32, %v908_v33  ;;  %v924_v16 = vshrl.u32 %v2816_v39, %v909_v20 }
  0x8c   : > { %vm3267_vm8 = vcmp.le.f32.partialorder %v998_v8, 0.7853982  ;;  %v1066_v18 = vclz %v2428_v59  ;;  %v910_v23 = vshrl.u32 %v2811_v24, %v909_v20  ;;  %v919_v29 = vor.u32 %v918_v54, %v917_v53 }
  0x8d   : > { %v2635_v27 = vpop.eup %2634  ;;  %vm926_vm10 = vcmp.lt.s32.totalorder %v3236_v43, 1  ;;  %v1085_v33 = vsel %vm1000_vm15, %v1084_v48, %v1060_v9  ;;  %v925_v40 = vor.u32 %v924_v16, %v923_v11  ;;  %vm928_vm13 = vcmp.lt.s32.totalorder %v3236_v43, 3 }
  0x8e   : > { %v2637_v17 = vpop.eup %2636  ;;  %v682_v15 = vxor.u32 2147483648, %v2635_v27  ;;  %v2429_v49 = vadd.s32 4294967294, %v1066_v18  ;;  %vm927_vm14 = vcmp.lt.s32.totalorder %v3236_v43, 2  ;;  %vm929_vm6 = vcmp.lt.s32.totalorder %v3236_v43, 4 }
  0x8f   : > { %v679_v34 = vxor.u32 2147483648, %v2637_v17  ;;  %v931_v20 = vsel %vm929_vm6, %v919_v29, 2102212464  ;;  %v934_v44 = vsel %vm926_vm10, %v913_v10, %v916_v62  ;;  %v935_v9 = vsel %vm929_vm6, %v922_v63, 920167782 }
  0x90   : > { %v683_v8 = vsel %vm681_vm11, %v682_v15, %v2637_v17  ;;  %vm574_vm5 = vcmp.eq.s32.totalorder %v3226_v37, 0  ;;  %vm2430_vm4 = vcmp.lt.s32.totalorder %v2429_v49, 0  ;;  %v930_v36 = vsel %vm926_vm10, %v910_v23, %v913_v10 }
  0x91   : > { %v680_v47 = vsel %vm678_vm7, %v2635_v27, %v679_v34  ;;  %v936_v50 = vsel %vm928_vm13, %v919_v29, %v935_v9  ;;  %vm573_vm11 = vcmp.lt.s32.totalorder %v3226_v37, 2  ;;  %v1069_v53 = vsel %vm2430_vm4, 0, %v2429_v49 }
  0x92   : > { %v684_v31 = vsel %vm677_vm9, %v680_v47, %v683_v8  ;;  %v932_v12 = vsel %vm928_vm13, %v916_v62, %v931_v20  ;;  %v937_v25 = vsel %vm927_vm14, %v934_v44, %v936_v50  ;;  %vm570_vm7 = vweird.f32 %v2989_v52 }
  0x93   : > { %v685_v51 = vsel %vm674_vm12, nan, %v684_v31  ;;  %v1070_v54 = vsub.s32 32, %v1069_v53  ;;  %v1071_v55 = vshll.u32 %v3241_v13, %v1069_v53  ;;  %v1074_v22 = vsub.s32 4294967266, %v1069_v53 }
  0x94   : > { %1758 = vxpose.xlu1.b32.start [1/3] (short) %v685_v51, 128  ;;  %v938_v1 = vsel %vm926_vm10, %v916_v62, %v919_v29  ;;  %v939_v48 = vsel %vm929_vm6, %v925_v40, 1326507024  ;;  %v3309_v59 = vmul.u32.u64.low %v3238_v21, %v937_v25  ;;  %v3310_v10 = vmul.u32.u64.high %v3238_v21, %v937_v25, %v3309_v59 }
  0x95   : > { %v1072_v46 = vshrl.u32 %v3234_v41, %v1070_v54  ;;  %v1075_v11 = vadd.s32 127, %v1074_v22  ;;  %v940_v16 = vsel %vm928_vm13, %v922_v63, %v939_v48  ;;  %v1422_v13 = vor.u32 8388608, %v3260_v0 }
  0x96   : > { %v1087_v27 = vsel %vm3267_vm8, 0, %v1085_v33  ;;  %v933_v62 = vsel %vm927_vm14, %v930_v36, %v932_v12  ;;  %v941_v18 = vsel %vm927_vm14, %v938_v1, %v940_v16  ;;  %vm1425_vm4 = vcmp.gt.s32.totalorder %v1424_v57, 0 }
  0x97   : > { %v1073_v23 = vor.u32 %v1072_v46, %v1071_v55  ;;  %v1076_v29 = vshll.u32 %v1075_v11, 23  ;;  %v3324_v41 = vmul.u32.u64.low %v3238_v21, %v941_v18  ;;  %v3325_v17 = vmul.u32.u64.high %v3238_v21, %v941_v18, %v3324_v41  ;;  %v2639_v15 = vpop.eup %2638 }
  0x98   : > { %vm577_vm6 = vcmp.eq.s32.totalorder %v3226_v37, 2  ;;  %v952_v0 = vadd.s32 1, %v3310_v10  ;;  %v1426_v63 = vsel %vm1425_vm4, %v1424_v57, 0  ;;  %v3334_v43 = vsel %vm406_vm3, %v454_v35, %v458_v60  ;;  %v2641_v33 = vpop.eup %2640 }
  0x99   : > { %v578_v40 = vxor.u32 2147483648, %v2639_v15  ;;  %v1077_v34 = vor.u32 4788187, %v1076_v29  ;;  %v1080_v49 = vcvt.s32.f32 %v1073_v23  ;;  %v949_v8 = vmul.u32 %v3238_v21, %v933_v62 }
  0x9a   : > { %v575_v20 = vxor.u32 2147483648, %v2641_v33  ;;  %v1091_v44 = vadd.s32 3, %v1087_v27  ;;  %v1428_v9 = vand.u32 31, %v1426_v63  ;;  %v3337_v47 = vshll.u32 %v1422_v13, 8 }
  0x9b   : > { %v579_v36 = vsel %vm577_vm6, %v578_v40, %v2641_v33  ;;  %v1078_v57 = vand.u32 2147483647, %v1077_v34  ;;  %vm951_vm9 = vc.u32 %v3325_v17, %v3309_v59  ;;  %v1313_v19 = vand.u32 2139095040, %v3334_v43 }
  0x9c   : > { %v576_v35 = vsel %vm574_vm5, %v2639_v15, %v575_v20  ;;  %vm896_vm12 = vcmp.lt.s32.totalorder %v3112_v42, 0  ;;  %v953_v56 = vsel %vm951_vm9, %v952_v0, %v3310_v10  ;;  %v1429_v60 = vsub.s32 32, %v1428_v9 }
  0x9d   : > { %v1431_v21 = vshll.u32 %v2811_v24, %v1428_v9  ;;  %v580_v50 = vsel %vm573_vm11, %v576_v35, %v579_v36  ;;  %v1081_v31 = vmul.f32 %v1080_v49, %v1078_v57  ;;  %v954_v53 = vadd.s32 %v953_v56, %v949_v8 }
  0x9e   : > { %v1434_v12 = vshll.u32 %v2812_v26, %v1428_v9  ;;  %v581_v25 = vsel %vm570_vm7, nan, %v580_v50  ;;  %v1427_v51 = vshrl.u32 %v1426_v63, 5  ;;  %v1432_v54 = vshrl.u32 %v2812_v26, %v1429_v60 }
  0x9f   : > { %v1435_v55 = vshrl.u32 %v2813_v28, %v1429_v60  ;;  %1726 = vxpose.xlu0.b32.start [1/3] (short) %v581_v25, 128  ;;  %v1082_v22 = vxor.u32 2147483648, %v1081_v31  ;;  %vm3356_vm5 = vcmp.le.f32.partialorder %v894_v45, 0.7853982  ;;  %v955_v37 = vadd.s32 536870912, %v954_v53 }
  0xa0   : > { %v1437_v48 = vshll.u32 %v2813_v28, %v1428_v9  ;;  %v1438_v10 = vshrl.u32 %v2814_v30, %v1429_v60  ;;  %v1430_v52 = vshrl.u32 %v2811_v24, %v1429_v60  ;;  %v1433_v46 = vor.u32 %v1432_v54, %v1431_v21 }
  0xa1   : > { %v1440_v11 = vshll.u32 %v2814_v30, %v1428_v9  ;;  %v1441_v16 = vshrl.u32 %v2815_v32, %v1429_v60  ;;  %v1083_v13 = vsel %vm1000_vm15, %v1082_v22, %v1081_v31  ;;  %v956_v27 = vshrl.u32 %v955_v37, 30  ;;  %v3400_v22 = vld [vmem:[%s2920_s20 + $0x8] sm:$0x77] }
  0xa2   : > { %v1436_v45 = vor.u32 %v1435_v55, %v1434_v12  ;;  %v1443_v62 = vshll.u32 %v2815_v32, %v1428_v9  ;;  %v1086_v18 = vsel %vm3267_vm8, %v3012_v6, %v1083_v13  ;;  %v1439_v23 = vor.u32 %v1438_v10, %v1437_v48 }
  0xa3   : > { %v1442_v29 = vor.u32 %v1441_v16, %v1440_v11  ;;  %v1444_v41 = vshrl.u32 %v2816_v39, %v1429_v60  ;;  %2642 = vcosq.f32 %v1086_v18  ;;  %v957_v15 = vshll.u32 %v956_v27, 30 }
  0xa4   : > { %v980_v0 = vsub.s32 4, %v956_v27  ;;  %vm1446_vm10 = vcmp.lt.s32.totalorder %v1427_v51, 1  ;;  %2644 = vsinq.f32 %v1086_v18  ;;  %vm1448_vm13 = vcmp.lt.s32.totalorder %v1427_v51, 3 }
  0xa5   : > { %v1445_v63 = vor.u32 %v1444_v41, %v1443_v62  ;;  %vm1449_vm15 = vcmp.lt.s32.totalorder %v1427_v51, 4  ;;  %v3372_v33 = vsub.s32 %v954_v53, %v957_v15  ;;  %vm1447_vm14 = vcmp.lt.s32.totalorder %v1427_v51, 2 }
  0xa6   : > { %v981_v40 = vsel %vm896_vm12, %v980_v0, %v956_v27  ;;  %v1314_v61 = vshrl.u32 %v1313_v19, 23  ;;  %v1451_v34 = vsel %vm1449_vm15, %v1439_v23, 2102212464  ;;  %v1454_v49 = vsel %vm1446_vm10, %v1433_v46, %v1436_v45 }
  0xa7   : > { %v1455_v8 = vsel %vm1449_vm15, %v1442_v29, 920167782  ;;  %v1310_v20 = vand.u32 2147483647, %v3334_v43  ;;  %v1092_v9 = vand.u32 3, %v1091_v44  ;;  %v960_v36 = vsub.s32 0, %v3372_v33 }
  0xa8   : > { %v1450_v57 = vsel %vm1446_vm10, %v1430_v52, %v1433_v46  ;;  %v1456_v35 = vsel %vm1448_vm13, %v1439_v23, %v1455_v8  ;;  %v983_v56 = vsel %vm3356_vm5, 0, %v981_v40  ;;  %v1458_v60 = vsel %vm1446_vm10, %v1436_v45, %v1439_v23 }
  0xa9   : > { %v1457_v19 = vsel %vm1447_vm14, %v1454_v49, %v1456_v35  ;;  %v1459_v21 = vsel %vm1449_vm15, %v1445_v63, 1326507024  ;;  %v2424_v50 = vmin.u32 %v960_v36, %v3372_v33  ;;  %v1452_v31 = vsel %vm1448_vm13, %v1436_v45, %v1451_v34 }
  0xaa   : > { %v1460_v44 = vsel %vm1448_vm13, %v1442_v29, %v1459_v21  ;;  %v2439_v53 = vadd.s32 4294967169, %v1314_v61  ;;  %v3393_v25 = vmul.u32.u64.low %v3337_v47, %v1457_v19  ;;  %v3394_v54 = vmul.u32.u64.high %v3337_v47, %v1457_v19, %v3393_v25 }
  0xab   : > { %v1461_v12 = vsel %vm1447_vm14, %v1458_v60, %v1460_v44  ;;  %v1317_v55 = vand.u32 8388607, %v1310_v20  ;;  %v962_v37 = vclz %v2424_v50  ;;  %v987_v48 = vadd.s32 3, %v983_v56 }
  0xac   : > { %v1453_v10 = vsel %vm1447_vm14, %v1450_v57, %v1452_v31  ;;  %v3404_v52 = vmul.u32.u64.low %v3337_v47, %v1461_v12  ;;  %v3405_v46 = vmul.u32.u64.high %v3337_v47, %v1461_v12, %v3404_v52  ;;  %v1320_v11 = vadd.s32 1, %v2439_v53 }
  0xad   : > { %vm1090_vm8 = vweird.f32 %v3012_v6  ;;  %vm1093_vm11 = vcmp.lt.s32.totalorder %v1092_v9, 2  ;;  %v2425_v16 = vadd.s32 4294967294, %v962_v37  ;;  %v3409_v13 = vmul.f32 10.079369, %v3400_v22 }
  0xae   : > { %vm1094_vm7 = vcmp.eq.s32.totalorder %v1092_v9, 0  ;;  %v1472_v27 = vadd.s32 1, %v3394_v54  ;;  %v1318_v45 = vor.u32 8388608, %v1317_v55  ;;  %vm1321_vm4 = vcmp.gt.s32.totalorder %v1320_v11, 0 }
  0xaf   : > { %v950_v51 = vadd.s32 %v3309_v59, %v3325_v17  ;;  %vm2426_vm6 = vcmp.lt.s32.totalorder %v2425_v16, 0  ;;  %v1469_v62 = vmul.u32 %v3337_v47, %v1453_v10  ;;  %v1322_v18 = vsel %vm1321_vm4, %v1320_v11, 0 }
  0xb0   : > { %v2643_v23 = vpop.eup %2642  ;;  %vm1097_vm9 = vcmp.eq.s32.totalorder %v1092_v9, 2  ;;  %v965_v29 = vsel %vm2426_vm6, 0, %v2425_v16  ;;  %v3415_v41 = vand.u32 3, %v987_v48  ;;  %vm1471_vm10 = vc.u32 %v3405_v46, %v3393_v25 }
  0xb1   : > { %v2645_v15 = vpop.eup %2644  ;;  %v1098_v0 = vxor.u32 2147483648, %v2643_v23  ;;  %v966_v63 = vsub.s32 32, %v965_v29  ;;  %v967_v40 = vshll.u32 %v3372_v33, %v965_v29  ;;  %v970_v61 = vsub.s32 4294967266, %v965_v29 }
  0xb2   : > { %v1095_v34 = vxor.u32 2147483648, %v2645_v15  ;;  %v1473_v59 = vsel %vm1471_vm10, %v1472_v27, %v3394_v54  ;;  %v1324_v17 = vand.u32 31, %v1322_v18  ;;  %v3421_v47 = vshll.u32 %v1318_v45, 8 }
  0xb3   : > { %v1099_v49 = vsel %vm1097_vm9, %v1098_v0, %v2645_v15  ;;  %v968_v8 = vshrl.u32 %v950_v51, %v966_v63  ;;  %v971_v36 = vadd.s32 127, %v970_v61  ;;  %v1474_v57 = vadd.s32 %v1473_v59, %v1469_v62 }
  0xb4   : > { %v1096_v35 = vsel %vm1094_vm7, %v2643_v23, %v1095_v34  ;;  %v1325_v56 = vsub.s32 32, %v1324_v17  ;;  %v3425_v19 = vmul.f32 101.593666, %v3400_v22  ;;  %v3428_v60 = vmul.f32 1024.0, %v3400_v22 }
  0xb5   : > { %v1100_v33 = vsel %vm1093_vm11, %v1096_v35, %v1099_v49  ;;  %v969_v21 = vor.u32 %v968_v8, %v967_v40  ;;  %v972_v50 = vshll.u32 %v971_v36, 23  ;;  %v1475_v31 = vadd.s32 536870912, %v1474_v57 }
  0xb6   : > { %v1101_v44 = vsel %vm1090_vm8, nan, %v1100_v33  ;;  %v1327_v53 = vshll.u32 %v2811_v24, %v1324_v17  ;;  %v1328_v12 = vshrl.u32 %v2812_v26, %v1325_v56  ;;  %v1330_v54 = vshll.u32 %v2812_v26, %v1324_v17 }
  0xb7   : > { %1759 = vxpose.xlu1.b32.cont [2/3] (short) %v1101_v44, 128  ;;  %v973_v55 = vor.u32 4788187, %v972_v50  ;;  %v976_v37 = vcvt.s32.f32 %v969_v21  ;;  %v3436_v48 = vshrl.u32 %v1475_v31, 30  ;;  %v1331_v9 = vshrl.u32 %v2813_v28, %v1325_v56 }
  0xb8   : > { %v1323_v10 = vshrl.u32 %v1322_v18, 5  ;;  %v1333_v52 = vshll.u32 %v2813_v28, %v1324_v17  ;;  %v1334_v11 = vshrl.u32 %v2814_v30, %v1325_v56  ;;  %v1336_v6 = vshll.u32 %v2814_v30, %v1324_v17 }
  0xb9   : > { %v974_v16 = vand.u32 2147483647, %v973_v55  ;;  %v1477_v27 = vshll.u32 %v3436_v48, 30  ;;  %v1337_v45 = vshrl.u32 %v2815_v32, %v1325_v56  ;;  %v160_v51 = vrot.slane %v3400_v22, %v2926_v2 }
  0xba   : > { %v1326_v62 = vshrl.u32 %v2811_v24, %v1325_v56  ;;  %v1329_v23 = vor.u32 %v1328_v12, %v1327_v53  ;;  %v1339_v29 = vshll.u32 %v2815_v32, %v1324_v17  ;;  %v1340_v18 = vshrl.u32 %v2816_v39, %v1325_v56 }
  0xbb   : > { %v977_v15 = vmul.f32 %v976_v37, %v974_v16  ;;  %v3449_v0 = vsub.s32 %v1474_v57, %v1477_v27  ;;  %v1332_v63 = vor.u32 %v1331_v9, %v1330_v54  ;;  %v1338_v40 = vor.u32 %v1337_v45, %v1336_v6 }
  0xbc   : > { %v1335_v61 = vor.u32 %v1334_v11, %v1333_v52  ;;  %v1341_v34 = vor.u32 %v1340_v18, %v1339_v29  ;;  %vm1342_vm13 = vcmp.lt.s32.totalorder %v1323_v10, 1  ;;  %vm1345_vm15 = vcmp.lt.s32.totalorder %v1323_v10, 4 }
  0xbd   : > { %v978_v59 = vxor.u32 2147483648, %v977_v15  ;;  %v1480_v49 = vsub.s32 0, %v3449_v0  ;;  %vm1344_vm14 = vcmp.lt.s32.totalorder %v1323_v10, 3  ;;  %v182_v8 = vrot.slane %v3409_v13, %v2926_v2 }
  0xbe   : > { %vm1343_vm8 = vcmp.lt.s32.totalorder %v1323_v10, 2  ;;  %v1346_v17 = vsel %vm1342_vm13, %v1326_v62, %v1329_v23  ;;  %v1347_v36 = vsel %vm1345_vm15, %v1335_v61, 2102212464  ;;  %v1351_v57 = vsel %vm1345_vm15, %v1338_v40, 920167782 }
  0xbf   : > { %v979_v35 = vsel %vm896_vm12, %v978_v59, %v977_v15  ;;  %v2444_v56 = vmin.u32 %v1480_v49, %v3449_v0  ;;  %v1348_v33 = vsel %vm1344_vm14, %v1332_v63, %v1347_v36  ;;  %v1350_v21 = vsel %vm1342_vm13, %v1329_v23, %v1332_v63 }
  0xc0   : > { %v982_v50 = vsel %vm3356_vm5, %v3112_v42, %v979_v35  ;;  %v1352_v31 = vsel %vm1344_vm14, %v1335_v61, %v1351_v57  ;;  %v1354_v44 = vsel %vm1342_vm13, %v1332_v63, %v1335_v61  ;;  %v1355_v53 = vsel %vm1345_vm15, %v1341_v34, 1326507024 }
  0xc1   : > { %2646 = vcosq.f32 %v982_v50  ;;  %v1482_v12 = vclz %v2444_v56  ;;  %v204_v54 = vrot.slane %v3425_v19, %v2926_v2  ;;  %v226_v55 = vrot.slane %v3428_v60, %v2926_v2 }
  0xc2   : > { %2648 = vsinq.f32 %v982_v50  ;;  %v1349_v37 = vsel %vm1343_vm8, %v1346_v17, %v1348_v33  ;;  %v1353_v1 = vsel %vm1343_vm8, %v1350_v21, %v1352_v31  ;;  %v1356_v9 = vsel %vm1344_vm14, %v1338_v40, %v1355_v53 }
  0xc3   : > { %v2445_v52 = vadd.s32 4294967294, %v1482_v12  ;;  %v1357_v11 = vsel %vm1343_vm8, %v1354_v44, %v1356_v9  ;;  %v3477_v6 = vmul.u32.u64.low %v3421_v47, %v1353_v1  ;;  %v3478_v16 = vmul.u32.u64.high %v3421_v47, %v1353_v1, %v3477_v6 }
  0xc4   : > { %v1470_v27 = vadd.s32 %v3393_v25, %v3405_v46  ;;  %v1500_v2 = vsub.s32 4, %v3436_v48  ;;  %v3485_v45 = vmul.u32.u64.low %v3421_v47, %v1357_v11  ;;  %v3486_v62 = vmul.u32.u64.high %v3421_v47, %v1357_v11, %v3485_v45 }
  0xc5   : > { %vm2446_vm12 = vcmp.lt.s32.totalorder %v2445_v52, 0  ;;  %v1365_v23 = vmul.u32 %v3421_v47, %v1349_v37  ;;  %v246_v10 = vrot.slane %v3400_v22, %v2928_v3  ;;  %v266_v29 = vrot.slane %v3409_v13, %v2928_v3 }
  0xc6   : > { %v1485_v18 = vsel %vm2446_vm12, 0, %v2445_v52  ;;  %v286_v15 = vrot.slane %v3425_v19, %v2928_v3  ;;  %v306_v25 = vrot.slane %v3428_v60, %v2928_v3  ;;  %v395_v46 = vsel %vm391_vm0, %v160_v51, %v182_v8 }
  0xc7   : > { %v1486_v63 = vsub.s32 32, %v1485_v18  ;;  %v1487_v40 = vshll.u32 %v3449_v0, %v1485_v18  ;;  %v1490_v61 = vsub.s32 4294967266, %v1485_v18  ;;  %v1368_v47 = vadd.s32 1, %v3478_v16 }
  0xc8   : > { %vm1367_vm5 = vc.u32 %v3486_v62, %v3477_v6  ;;  %v400_v34 = vsel %vm396_vm1, %v395_v46, %v204_v54  ;;  %v156_v59 = vrot.slane %v3400_v22, %v2930_v4  ;;  %v178_v49 = vrot.slane %v3409_v13, %v2930_v4 }
  0xc9   : > { %vm986_vm11 = vweird.f32 %v3112_v42  ;;  %v1488_v3 = vshrl.u32 %v1470_v27, %v1486_v63  ;;  %v1491_v51 = vadd.s32 127, %v1490_v61  ;;  %v1369_v0 = vsel %vm1367_vm5, %v1368_v47, %v3478_v16 }
  0xca   : > { %v405_v8 = vsel %vm401_vm2, %v400_v34, %v226_v55  ;;  %vm3512_vm7 = vcmp.le.f32.partialorder %v1414_v38, 0.7853982  ;;  %vm1416_vm4 = vcmp.lt.s32.totalorder %v3186_v58, 0  ;;  %v1370_v36 = vadd.s32 %v1369_v0, %v1365_v23 }
  0xcb   : > { %v410_v57 = vsel %vm406_vm3, %v405_v8, %v246_v10  ;;  %v1489_v35 = vor.u32 %v1488_v3, %v1487_v40  ;;  %v1492_v56 = vshll.u32 %v1491_v51, 23  ;;  %vm4515_vm6 = vcmask 1044480  }
  0xcc   : > { %v415_v33 = vsel %vm4515_vm6, %v410_v57, %v266_v29  ;;  %v200_v21 = vrot.slane %v3425_v19, %v2930_v4  ;;  %vm990_vm9 = vcmp.eq.s32.totalorder %v3415_v41, 0  ;;  %v1501_v38 = vsel %vm1416_vm4, %v1500_v2, %v3436_v48  ;;  %vm4518_vm5 = vmmov %vm4515_vm6 }
  0xcd   : > { %v1371_v50 = vadd.s32 536870912, %v1370_v36  ;;  %vm4516_vm10 = vcmask 1045504   ;;  %v1493_v44 = vor.u32 4788187, %v1492_v56  ;;  %v1496_v53 = vcvt.s32.f32 %v1489_v35 }
  0xce   : > { %v420_v31 = vsel %vm4516_vm10, %v415_v33, %v286_v15  ;;  %vm4517_vm13 = vcmask 1046528   ;;  %v394_v54 = vsel %vm391_vm0, %v156_v59, %v178_v49  ;;  %v2647_v55 = vpop.eup %2646  ;;  %vm993_vm15 = vcmp.eq.s32.totalorder %v3415_v41, 2 }
  0xcf   : > { %v3527_v12 = vsel %vm4517_vm13, %v420_v31, %v306_v25  ;;  %v1372_v37 = vshrl.u32 %v1371_v50, 30  ;;  %v222_v9 = vrot.slane %v3428_v60, %v2930_v4  ;;  %v2649_v48 = vpop.eup %2648  ;;  %v994_v52 = vxor.u32 2147483648, %v2647_v55 }
  0xd0   : > { %v793_v1 = vand.u32 2139095040, %v3527_v12  ;;  %v1494_v11 = vand.u32 2147483647, %v1493_v44  ;;  %v790_v16 = vand.u32 2147483647, %v3527_v12  ;;  %v399_v27 = vsel %vm396_vm1, %v394_v54, %v200_v21 }
  0xd1   : > { %vm989_vm14 = vcmp.lt.s32.totalorder %v3415_v41, 2  ;;  %v991_v2 = vxor.u32 2147483648, %v2649_v48  ;;  %v1503_v45 = vsel %vm3512_vm7, 0, %v1501_v38  ;;  %v1373_v23 = vshll.u32 %v1372_v37, 30 }
  0xd2   : > { %v995_v10 = vsel %vm993_vm15, %v994_v52, %v2649_v48  ;;  %v1497_v29 = vmul.f32 %v1496_v53, %v1494_v11  ;;  %v794_v18 = vshrl.u32 %v793_v1, 23  ;;  %v242_v4 = vrot.slane %v3400_v22, %v2932_v5 }
  0xd3   : > { %v992_v15 = vsel %vm990_vm9, %v2647_v55, %v991_v2  ;;  %v3543_v25 = vsub.s32 %v1370_v36, %v1373_v23  ;;  %v262_v46 = vrot.slane %v3409_v13, %v2932_v5  ;;  %v404_v63 = vsel %vm401_vm2, %v399_v27, %v222_v9 }
  0xd4   : > { %v996_v40 = vsel %vm989_vm14, %v992_v15, %v995_v10  ;;  %v1498_v61 = vxor.u32 2147483648, %v1497_v29  ;;  %v2419_v47 = vadd.s32 4294967169, %v794_v18  ;;  %v797_v34 = vand.u32 8388607, %v790_v16 }
  0xd5   : > { %v997_v59 = vsel %vm986_vm11, nan, %v996_v40  ;;  %v1507_v49 = vadd.s32 3, %v1503_v45  ;;  %v1376_v41 = vsub.s32 0, %v3543_v25  ;;  %v1396_v3 = vsub.s32 4, %v1372_v37  ;;  %vm4519_vm11 = vmmov %vm4516_vm10 }
  0xd6   : > { %1727 = vxpose.xlu0.b32.cont [2/3] (short) %v997_v59, 128  ;;  %v1499_v51 = vsel %vm1416_vm4, %v1498_v61, %v1497_v29  ;;  %v800_v0 = vadd.s32 1, %v2419_v47  ;;  %v282_v8 = vrot.slane %v3425_v19, %v2932_v5  ;;  %v409_v36 = vsel %vm406_vm3, %v404_v63, %v242_v4  ;;  %vm4522_vm4 = vmmov %vm4517_vm13 }
  0xd7   : > { %v1502_v57 = vsel %vm3512_vm7, %v3186_v58, %v1499_v51  ;;  %vm1312_vm8 = vcmp.lt.s32.totalorder %v3334_v43, 0  ;;  %v2440_v42 = vmin.u32 %v1376_v41, %v3543_v25  ;;  %v302_v35 = vrot.slane %v3428_v60, %v2932_v5 }
  0xd8   : > { %2650 = vcosq.f32 %v1502_v57  ;;  %v798_v56 = vor.u32 8388608, %v797_v34  ;;  %vm801_vm12 = vcmp.gt.s32.totalorder %v800_v0, 0  ;;  %v414_v33 = vsel %vm4518_vm5, %v409_v36, %v262_v46 }
  0xd9   : > { %2652 = vsinq.f32 %v1502_v57  ;;  %v3566_v21 = vand.u32 3, %v1507_v49  ;;  %v1378_v38 = vclz %v2440_v42  ;;  %v3570_v17 = vsel %vm1312_vm8, %v1396_v3, %v1372_v37 }
  0xda   : > { %v802_v50 = vsel %vm801_vm12, %v800_v0, 0  ;;  %v419_v31 = vsel %vm4519_vm11, %v414_v33, %v282_v8  ;;  %vm3575_vm7 = vcmp.le.f32.partialorder %v1310_v20, 0.7853982  ;;  %v1366_v44 = vadd.s32 %v3477_v6, %v3486_v62 }
  0xdb   : > { %v2441_v53 = vadd.s32 4294967294, %v1378_v38  ;;  %v804_v54 = vand.u32 31, %v802_v50  ;;  %v1399_v55 = vsel %vm3575_vm7, 0, %v3570_v17  ;;  %v3584_v37 = vshrl.u32 %v802_v50, 5 }
  0xdc   : > { %v3586_v1 = vshll.u32 %v798_v56, 8  ;;  %v3589_v9 = vsel %vm4522_vm4, %v419_v31, %v302_v35  ;;  %vm1513_vm6 = vcmp.eq.s32.totalorder %v3566_v21, 2  ;;  %vm1510_vm10 = vcmp.eq.s32.totalorder %v3566_v21, 0 }
  0xdd   : > { %vm2442_vm9 = vcmp.lt.s32.totalorder %v2441_v53, 0  ;;  %v805_v20 = vsub.s32 32, %v804_v54  ;;  %v807_v48 = vshll.u32 %v2811_v24, %v804_v54  ;;  %v810_v6 = vshll.u32 %v2812_v26, %v804_v54 }
  0xde   : > { %v1381_v62 = vsel %vm2442_vm9, 0, %v2441_v53  ;;  %v813_v52 = vshll.u32 %v2813_v28, %v804_v54  ;;  %v816_v11 = vshll.u32 %v2814_v30, %v804_v54  ;;  %v819_v27 = vshll.u32 %v2815_v32, %v804_v54 }
  0xdf   : > { %vm1509_vm13 = vcmp.lt.s32.totalorder %v3566_v21, 2  ;;  %v1382_v2 = vsub.s32 32, %v1381_v62  ;;  %v1383_v45 = vshll.u32 %v3543_v25, %v1381_v62  ;;  %v1386_v23 = vsub.s32 4294967266, %v1381_v62 }
  0xe0   : > { %v806_v10 = vshrl.u32 %v2811_v24, %v805_v20  ;;  %vm1506_vm15 = vweird.f32 %v3186_v58  ;;  %v808_v29 = vshrl.u32 %v2812_v26, %v805_v20  ;;  %v811_v18 = vshrl.u32 %v2813_v28, %v805_v20 }
  0xe1   : > { %v814_v4 = vshrl.u32 %v2814_v30, %v805_v20  ;;  %v817_v15 = vshrl.u32 %v2815_v32, %v805_v20  ;;  %v1384_v46 = vshrl.u32 %v1366_v44, %v1382_v2  ;;  %v1387_v63 = vadd.s32 127, %v1386_v23 }
  0xe2   : > { %v820_v40 = vshrl.u32 %v2816_v39, %v805_v20  ;;  %vm822_vm14 = vcmp.lt.s32.totalorder %v3584_v37, 1  ;;  %v809_v25 = vor.u32 %v808_v29, %v807_v48  ;;  %v812_v61 = vor.u32 %v811_v18, %v810_v6 }
  0xe3   : > { %v815_v47 = vor.u32 %v814_v4, %v813_v52  ;;  %v818_v34 = vor.u32 %v817_v15, %v816_v11  ;;  %v1385_v59 = vor.u32 %v1384_v46, %v1383_v45  ;;  %v1388_v49 = vshll.u32 %v1387_v63, 23 }
  0xe4   : > { %v821_v41 = vor.u32 %v820_v40, %v819_v27  ;;  %v689_v3 = vand.u32 2139095040, %v3589_v9  ;;  %vm823_vm12 = vcmp.lt.s32.totalorder %v3584_v37, 2  ;;  %vm824_vm5 = vcmp.lt.s32.totalorder %v3584_v37, 3 }
  0xe5   : > { %vm825_vm11 = vcmp.lt.s32.totalorder %v3584_v37, 4  ;;  %v830_v51 = vsel %vm822_vm14, %v809_v25, %v812_v61  ;;  %v2651_v0 = vpop.eup %2650  ;;  %v1389_v8 = vor.u32 4788187, %v1388_v49  ;;  %v1392_v36 = vcvt.s32.f32 %v1385_v59 }
  0xe6   : > { %v827_v57 = vsel %vm825_vm11, %v815_v47, 2102212464  ;;  %v831_v42 = vsel %vm825_vm11, %v818_v34, 920167782  ;;  %v2653_v35 = vpop.eup %2652  ;;  %v1514_v56 = vxor.u32 2147483648, %v2651_v0  ;;  %v826_v33 = vsel %vm822_vm14, %v806_v10, %v809_v25 }
  0xe7   : > { %v828_v38 = vsel %vm824_vm5, %v812_v61, %v827_v57  ;;  %v832_v50 = vsel %vm824_vm5, %v815_v47, %v831_v42  ;;  %v1511_v31 = vxor.u32 2147483648, %v2653_v35  ;;  %v1390_v44 = vand.u32 2147483647, %v1389_v8 }
  0xe8   : > { %v833_v53 = vsel %vm823_vm12, %v830_v51, %v832_v50  ;;  %v834_v54 = vsel %vm822_vm14, %v812_v61, %v815_v47  ;;  %v1515_v20 = vsel %vm1513_vm6, %v1514_v56, %v2653_v35  ;;  %v835_v48 = vsel %vm825_vm11, %v821_v41, 1326507024 }
  0xe9   : > { %v3633_v6 = vmul.u32.u64.low %v3586_v1, %v833_v53  ;;  %v3634_v62 = vmul.u32.u64.high %v3586_v1, %v833_v53, %v3633_v6  ;;  %v1512_v52 = vsel %vm1510_vm10, %v2651_v0, %v1511_v31  ;;  %v1393_v11 = vmul.f32 %v1392_v36, %v1390_v44 }
  0xea   : > { %v836_v27 = vsel %vm824_vm5, %v818_v34, %v835_v48  ;;  %v686_v2 = vand.u32 2147483647, %v3589_v9  ;;  %v1516_v45 = vsel %vm1509_vm13, %v1512_v52, %v1515_v20  ;;  %v829_v23 = vsel %vm823_vm12, %v826_v33, %v828_v38 }
  0xeb   : > { %v837_v10 = vsel %vm823_vm12, %v834_v54, %v836_v27  ;;  %v690_v29 = vshrl.u32 %v689_v3, 23  ;;  %v1517_v18 = vsel %vm1506_vm15, nan, %v1516_v45  ;;  %v1394_v4 = vxor.u32 2147483648, %v1393_v11 }
  0xec   : > { %v3651_v15 = vmul.u32.u64.low %v3586_v1, %v837_v10  ;;  %v3652_v46 = vmul.u32.u64.high %v3586_v1, %v837_v10, %v3651_v15  ;;  %1760 = vxpose.xlu1.b32.end [3/3] (short) %v1517_v18, 128  ;;  %v848_v63 = vadd.s32 1, %v3634_v62  ;;  %v845_v25 = vmul.u32 %v3586_v1, %v829_v23 }
  0xed   : > { %v2415_v21 = vadd.s32 4294967169, %v690_v29  ;;  %v1395_v40 = vsel %vm1312_vm8, %v1394_v4, %v1393_v11  ;;  %v326_v37 = vrot.slane %v3400_v22, %v2935_v7  ;;  %v346_v58 = vrot.slane %v3409_v13, %v2935_v7 }
  0xee   : > { %v1398_v61 = vsel %vm3575_vm7, %v3334_v43, %v1395_v40  ;;  %v1403_v47 = vadd.s32 3, %v1399_v55  ;;  %vm847_vm8 = vc.u32 %v3652_v46, %v3633_v6  ;;  %v693_v1 = vand.u32 8388607, %v686_v2 }
  0xef   : > { %v696_v34 = vadd.s32 1, %v2415_v21  ;;  %2654 = vcosq.f32 %v1398_v61  ;;  %v849_v59 = vsel %vm847_vm8, %v848_v63, %v3634_v62  ;;  %v366_v49 = vrot.slane %v3425_v19, %v2935_v7 }
  0xf0   : > { %2656 = vsinq.f32 %v1398_v61  ;;  %v850_v41 = vadd.s32 %v849_v59, %v845_v25  ;;  %v429_v17 = vsel %vm391_vm0, %v326_v37, %v346_v58  ;;  %v3677_v55 = vand.u32 3, %v1403_v47 }
  0xf1   : > { %vm697_vm4 = vcmp.gt.s32.totalorder %v696_v34, 0  ;;  %v694_v0 = vor.u32 8388608, %v693_v1  ;;  %v386_v8 = vrot.slane %v3428_v60, %v2935_v7  ;;  %v3682_v36 = vadd.f32 1.5707964, %v3527_v12 }
  0xf2   : > { %v698_v5 = vsel %vm697_vm4, %v696_v34, 0  ;;  %v851_v51 = vadd.s32 536870912, %v850_v41  ;;  %v433_v56 = vsel %vm396_vm1, %v429_v17, %v366_v49  ;;  %vm1405_vm7 = vcmp.lt.s32.totalorder %v3677_v55, 2 }
  0xf3   : > { %v700_v3 = vand.u32 31, %v698_v5  ;;  %v699_v7 = vshrl.u32 %v698_v5, 5  ;;  %vm1406_vm6 = vcmp.eq.s32.totalorder %v3677_v55, 0  ;;  %vm1409_vm9 = vcmp.eq.s32.totalorder %v3677_v55, 2 }
  0xf4   : > { %v3687_v33 = vshrl.u32 %v851_v51, 30  ;;  %v3702_v27 = vsel %vm401_vm2, %v433_v56, %v386_v8  ;;  %v3706_v18 = vshll.u32 %v694_v0, 8  ;;  %v457_v4 = vrot.slane %v3682_v36, 4 }
  0xf5   : > { %v701_v57 = vsub.s32 32, %v700_v3  ;;  %v703_v42 = vshll.u32 %v2811_v24, %v700_v3  ;;  %v706_v35 = vshll.u32 %v2812_v26, %v700_v3  ;;  %v709_v38 = vshll.u32 %v2813_v28, %v700_v3 }
  0xf6   : > { %v712_v50 = vshll.u32 %v2814_v30, %v700_v3  ;;  %v715_v31 = vshll.u32 %v2815_v32, %v700_v3  ;;  %v853_v20 = vshll.u32 %v3687_v33, 30  ;;  %vm718_vm10 = vcmp.lt.s32.totalorder %v699_v7, 1 }
  0xf7   : > { %v704_v44 = vshrl.u32 %v2812_v26, %v701_v57  ;;  %v707_v53 = vshrl.u32 %v2813_v28, %v701_v57  ;;  %v710_v54 = vshrl.u32 %v2814_v30, %v701_v57  ;;  %v713_v48 = vshrl.u32 %v2815_v32, %v701_v57 }
  0xf8   : > { %v716_v62 = vshrl.u32 %v2816_v39, %v701_v57  ;;  %v3704_v45 = vsub.s32 %v850_v41, %v853_v20  ;;  %vm721_vm13 = vcmp.lt.s32.totalorder %v699_v7, 4  ;;  %vm792_vm15 = vcmp.lt.s32.totalorder %v3527_v12, 0 }
  0xf9   : > { %v705_v52 = vor.u32 %v704_v44, %v703_v42  ;;  %v708_v11 = vor.u32 %v707_v53, %v706_v35  ;;  %v711_v23 = vor.u32 %v710_v54, %v709_v38  ;;  %v714_v10 = vor.u32 %v713_v48, %v712_v50 }
  0xfa   : > { %v717_v29 = vor.u32 %v716_v62, %v715_v31  ;;  %v856_v15 = vsub.s32 0, %v3704_v45  ;;  %v702_v63 = vshrl.u32 %v2811_v24, %v701_v57  ;;  %vm719_vm14 = vcmp.lt.s32.totalorder %v699_v7, 2 }
  0xfb   : > { %vm720_vm12 = vcmp.lt.s32.totalorder %v699_v7, 3  ;;  %vm1402_vm5 = vweird.f32 %v3334_v43  ;;  %v723_v40 = vsel %vm721_vm13, %v711_v23, 2102212464  ;;  %v727_v25 = vsel %vm721_vm13, %v714_v10, 920167782 }
  0xfc   : > { %v2655_v21 = vpop.eup %2654  ;;  %v731_v37 = vsel %vm721_vm13, %v717_v29, 1326507024  ;;  %v2420_v47 = vmin.u32 %v856_v15, %v3704_v45  ;;  %v726_v34 = vsel %vm718_vm10, %v705_v52, %v708_v11  ;;  %v730_v1 = vsel %vm718_vm10, %v708_v11, %v711_v23 }
  0xfd   : > { %v2657_v58 = vpop.eup %2656  ;;  %v1410_v61 = vxor.u32 2147483648, %v2655_v21  ;;  %v728_v49 = vsel %vm720_vm12, %v711_v23, %v727_v25  ;;  %v732_v41 = vsel %vm720_vm12, %v714_v10, %v731_v37  ;;  %v3722_v5 = vsel %vm406_vm3, %v3702_v27, %v457_v4 }
  0xfe   : > { %v1407_v59 = vxor.u32 2147483648, %v2657_v58  ;;  %v858_v3 = vclz %v2420_v47  ;;  %v722_v51 = vsel %vm718_vm10, %v702_v63, %v705_v52  ;;  %v724_v0 = vsel %vm720_vm12, %v708_v11, %v723_v40 }
  0xff   : > { %v1411_v17 = vsel %vm1409_vm9, %v1410_v61, %v2657_v58  ;;  %v876_v57 = vsub.s32 4, %v3687_v33  ;;  %v729_v42 = vsel %vm719_vm14, %v726_v34, %v728_v49  ;;  %v733_v35 = vsel %vm719_vm14, %v730_v1, %v732_v41 }
 0x100   : > { %v1408_v8 = vsel %vm1406_vm6, %v2655_v21, %v1407_v59  ;;  %v2421_v38 = vadd.s32 4294967294, %v858_v3  ;;  %v3736_v50 = vmul.u32.u64.low %v3706_v18, %v733_v35  ;;  %v3737_v31 = vmul.u32.u64.high %v3706_v18, %v733_v35, %v3736_v50 }
 0x101   : > { %v1412_v56 = vsel %vm1405_vm7, %v1408_v8, %v1411_v17  ;;  %v725_v53 = vsel %vm719_vm14, %v722_v51, %v724_v0  ;;  %v3743_v54 = vmul.u32.u64.low %v3706_v18, %v729_v42  ;;  %v3744_v20 = vmul.u32.u64.high %v3706_v18, %v729_v42, %v3743_v54 }
 0x102   : > { %v1413_v44 = vsel %vm1402_vm5, nan, %v1412_v56  ;;  %v846_v48 = vadd.s32 %v3633_v6, %v3652_v46  ;;  %vm2422_vm11 = vcmp.lt.s32.totalorder %v2421_v38, 0  ;;  %v1209_v55 = vand.u32 2139095040, %v3722_v5 }
 0x103   : > { %1728 = vxpose.xlu0.b32.end [3/3] (short) %v1413_v44, 128  ;;  %v322_v62 = vrot.slane %v3400_v22, %v2942_v14  ;;  %v861_v52 = vsel %vm2422_vm11, 0, %v2421_v38  ;;  %v877_v43 = vsel %vm792_vm15, %v876_v57, %v3687_v33  ;;  %v1206_v7 = vand.u32 2147483647, %v3722_v5 }
 0x104   : > { %v342_v11 = vrot.slane %v3409_v13, %v2942_v14  ;;  %v862_v23 = vsub.s32 32, %v861_v52  ;;  %v863_v10 = vshll.u32 %v3704_v45, %v861_v52  ;;  %v866_v6 = vsub.s32 4294967266, %v861_v52 }
 0x105   : > { %v741_v46 = vmul.u32 %v3706_v18, %v725_v53  ;;  %vm743_vm8 = vc.u32 %v3737_v31, %v3743_v54  ;;  %v744_v22 = vadd.s32 1, %v3744_v20  ;;  %v1210_v29 = vshrl.u32 %v1209_v55, 23 }
 0x106   : > { %vm3763_vm4 = vcmp.le.f32.partialorder %v790_v16, 0.7853982  ;;  %v864_v15 = vshrl.u32 %v846_v48, %v862_v23  ;;  %v867_v63 = vadd.s32 127, %v866_v6  ;;  %v362_v13 = vrot.slane %v3425_v19, %v2942_v14 }
 0x107   : > { %v879_v45 = vsel %vm3763_vm4, 0, %v877_v43  ;;  %v745_v18 = vsel %vm743_vm8, %v744_v22, %v3744_v20  ;;  %v2435_v21 = vadd.s32 4294967169, %v1210_v29  ;;  %v1213_v40 = vand.u32 8388607, %v1206_v7 }
 0x108   : > { %v865_v25 = vor.u32 %v864_v15, %v863_v10  ;;  %v868_v37 = vshll.u32 %v867_v63, 23  ;;  %v746_v16 = vadd.s32 %v745_v18, %v741_v46  ;;  %v428_v58 = vsel %vm391_vm0, %v322_v62, %v342_v11 }
 0x109   : > { %v445_v61 = vadd.f32 1.5707964, %v3702_v27  ;;  %v1216_v47 = vadd.s32 1, %v2435_v21  ;;  %v382_v19 = vrot.slane %v3428_v60, %v2942_v14  ;;  %v3779_v34 = vadd.f32 1.5707964, %v3589_v9 }
 0x10a   : > { %v869_v1 = vor.u32 4788187, %v868_v37  ;;  %v872_v59 = vcvt.s32.f32 %v865_v25  ;;  %v883_v49 = vadd.s32 3, %v879_v45  ;;  %v747_v41 = vadd.s32 536870912, %v746_v16 }
 0x10b   : > { %v1214_v17 = vor.u32 8388608, %v1213_v40  ;;  %vm1217_vm7 = vcmp.gt.s32.totalorder %v1216_v47, 0  ;;  %v432_v3 = vsel %vm396_vm1, %v428_v58, %v362_v13  ;;  %v464_v57 = vrot.slane %v445_v61, 4 }
 0x10c   : > { %v870_v51 = vand.u32 2147483647, %v869_v1  ;;  %v748_v0 = vshrl.u32 %v747_v41, 30  ;;  %v1218_v8 = vsel %vm1217_vm7, %v1216_v47, 0  ;;  %v456_v42 = vrot.slane %v3779_v34, 4 }
 0x10d   : > { %v1220_v27 = vand.u32 31, %v1218_v8  ;;  %v3783_v14 = vand.u32 3, %v883_v49  ;;  %v3786_v56 = vsel %vm401_vm2, %v432_v3, %v382_v19  ;;  %v742_v38 = vadd.s32 %v3743_v54, %v3737_v31 }
 0x10e   : > { %v873_v35 = vmul.f32 %v872_v59, %v870_v51  ;;  %v749_v60 = vshll.u32 %v748_v0, 30  ;;  %v3790_v53 = vshll.u32 %v1214_v17, 8  ;;  %v3803_v31 = vsel %vm406_vm3, %v3786_v56, %v456_v42 }
 0x10f   : > { %v1221_v50 = vsub.s32 32, %v1220_v27  ;;  %v1223_v44 = vshll.u32 %v2811_v24, %v1220_v27  ;;  %v1226_v55 = vshll.u32 %v2812_v26, %v1220_v27  ;;  %v1229_v62 = vshll.u32 %v2813_v28, %v1220_v27 }
 0x110   : > { %v874_v20 = vxor.u32 2147483648, %v873_v35  ;;  %v3792_v48 = vsub.s32 %v746_v16, %v749_v60  ;;  %v1232_v11 = vshll.u32 %v2814_v30, %v1220_v27  ;;  %vm688_vm0 = vcmp.lt.s32.totalorder %v3589_v9, 0 }
 0x111   : > { %v1224_v52 = vshrl.u32 %v2812_v26, %v1221_v50  ;;  %v1227_v43 = vshrl.u32 %v2813_v28, %v1221_v50  ;;  %v1219_v10 = vshrl.u32 %v1218_v8, 5  ;;  %v1230_v6 = vshrl.u32 %v2814_v30, %v1221_v50 }
 0x112   : > { %v875_v54 = vsel %vm792_vm15, %v874_v20, %v873_v35  ;;  %v752_v23 = vsub.s32 0, %v3792_v48  ;;  %v1222_v22 = vshrl.u32 %v2811_v24, %v1221_v50  ;;  %v1233_v15 = vshrl.u32 %v2815_v32, %v1221_v50 }
 0x113   : > { %v878_v46 = vsel %vm3763_vm4, %v3527_v12, %v875_v54  ;;  %v1225_v29 = vor.u32 %v1224_v52, %v1223_v44  ;;  %v1228_v13 = vor.u32 %v1227_v43, %v1226_v55  ;;  %v1231_v45 = vor.u32 %v1230_v6, %v1229_v62 }
 0x114   : > { %2658 = vcosq.f32 %v878_v46  ;;  %v2416_v63 = vmin.u32 %v752_v23, %v3792_v48  ;;  %v1234_v18 = vor.u32 %v1233_v15, %v1232_v11  ;;  %v1235_v21 = vshll.u32 %v2815_v32, %v1220_v27 }
 0x115   : > { %2660 = vsinq.f32 %v878_v46  ;;  %v1236_v40 = vshrl.u32 %v2816_v39, %v1221_v50  ;;  %vm3820_vm1 = vcmp.le.f32.partialorder %v686_v2, 0.7853982  ;;  %v772_v37 = vsub.s32 4, %v748_v0 }
 0x116   : > { %v754_v25 = vclz %v2416_v63  ;;  %v1105_v16 = vand.u32 2139095040, %v3803_v31  ;;  %v3828_v58 = vsel %vm406_vm3, %v457_v4, %v464_v57  ;;  %vm1238_vm2 = vcmp.lt.s32.totalorder %v1219_v10, 1 }
 0x117   : > { %v1237_v61 = vor.u32 %v1236_v40, %v1235_v21  ;;  %vm1239_vm6 = vcmp.lt.s32.totalorder %v1219_v10, 2  ;;  %vm1240_vm9 = vcmp.lt.s32.totalorder %v1219_v10, 3  ;;  %vm1241_vm10 = vcmp.lt.s32.totalorder %v1219_v10, 4 }
 0x118   : > { %v2417_v47 = vadd.s32 4294967294, %v754_v25  ;;  %v1242_v19 = vsel %vm1238_vm2, %v1222_v22, %v1225_v29  ;;  %v1246_v2 = vsel %vm1238_vm2, %v1225_v29, %v1228_v13  ;;  %v1243_v1 = vsel %vm1241_vm10, %v1231_v45, 2102212464 }
 0x119   : > { %v1247_v59 = vsel %vm1241_vm10, %v1234_v18, 920167782  ;;  %v1250_v49 = vsel %vm1238_vm2, %v1228_v13, %v1231_v45  ;;  %v1251_v41 = vsel %vm1241_vm10, %v1237_v61, 1326507024  ;;  %v1244_v17 = vsel %vm1240_vm9, %v1228_v13, %v1243_v1 }
 0x11a   : > { %vm2418_vm13 = vcmp.lt.s32.totalorder %v2417_v47, 0  ;;  %v1248_v3 = vsel %vm1240_vm9, %v1231_v45, %v1247_v59  ;;  %v1252_v51 = vsel %vm1240_vm9, %v1234_v18, %v1251_v41  ;;  %v773_v4 = vsel %vm688_vm0, %v772_v37, %v748_v0 }
 0x11b   : > { %v757_v36 = vsel %vm2418_vm13, 0, %v2417_v47  ;;  %v1249_v8 = vsel %vm1239_vm6, %v1246_v2, %v1248_v3  ;;  %v1253_v57 = vsel %vm1239_vm6, %v1250_v49, %v1252_v51  ;;  %vm882_vm15 = vweird.f32 %v3527_v12 }
 0x11c   : > { %v758_v27 = vsub.s32 32, %v757_v36  ;;  %v759_v35 = vshll.u32 %v3792_v48, %v757_v36  ;;  %v762_v60 = vsub.s32 4294967266, %v757_v36  ;;  %v1245_v50 = vsel %vm1239_vm6, %v1242_v19, %v1244_v17 }
 0x11d   : > { %v3838_v44 = vmul.u32.u64.low %v3790_v53, %v1253_v57  ;;  %v3839_v20 = vmul.u32.u64.high %v3790_v53, %v1253_v57, %v3838_v44  ;;  %v3842_v55 = vmul.u32.u64.low %v3790_v53, %v1249_v8  ;;  %v3843_v62 = vmul.u32.u64.high %v3790_v53, %v1249_v8, %v3842_v55 }
 0x11e   : > { %vm885_vm14 = vcmp.lt.s32.totalorder %v3783_v14, 2  ;;  %v760_v0 = vshrl.u32 %v742_v38, %v758_v27  ;;  %v763_v52 = vadd.s32 127, %v762_v60  ;;  %v1106_v43 = vshrl.u32 %v1105_v16, 23 }
 0x11f   : > { %vm886_vm12 = vcmp.eq.s32.totalorder %v3783_v14, 0  ;;  %vm889_vm5 = vcmp.eq.s32.totalorder %v3783_v14, 2  ;;  %v775_v48 = vsel %vm3820_vm1, 0, %v773_v4  ;;  %v1625_v11 = vand.u32 2139095040, %v3828_v58 }
 0x120   : > { %v761_v54 = vor.u32 %v760_v0, %v759_v35  ;;  %v764_v23 = vshll.u32 %v763_v52, 23  ;;  %v1261_v10 = vmul.u32 %v3790_v53, %v1245_v50  ;;  %v2431_v6 = vadd.s32 4294967169, %v1106_v43 }
 0x121   : > { %v2659_v46 = vpop.eup %2658  ;;  %vm1263_vm11 = vc.u32 %v3839_v20, %v3842_v55  ;;  %v1264_v38 = vadd.s32 1, %v3843_v62  ;;  %v1102_v22 = vand.u32 2147483647, %v3803_v31  ;;  %v1626_v29 = vshrl.u32 %v1625_v11, 23 }
 0x122   : > { %v2661_v15 = vpop.eup %2660  ;;  %v890_v63 = vxor.u32 2147483648, %v2659_v46  ;;  %v765_v13 = vor.u32 4788187, %v764_v23  ;;  %v768_v45 = vcvt.s32.f32 %v761_v54  ;;  %v1112_v18 = vadd.s32 1, %v2431_v6 }
 0x123   : > { %v887_v21 = vxor.u32 2147483648, %v2661_v15  ;;  %v779_v40 = vadd.s32 3, %v775_v48  ;;  %v1265_v25 = vsel %vm1263_vm11, %v1264_v38, %v3843_v62  ;;  %v3859_v53 = vadd.f32 1.5707964, %v3786_v56 }
 0x124   : > { %v891_v37 = vsel %vm889_vm5, %v890_v63, %v2661_v15  ;;  %v766_v16 = vand.u32 2147483647, %v765_v13  ;;  %v1266_v61 = vadd.s32 %v1265_v25, %v1261_v10  ;;  %vm1113_vm8 = vcmp.gt.s32.totalorder %v1112_v18, 0 }
 0x125   : > { %v888_v47 = vsel %vm886_vm12, %v2659_v46, %v887_v21  ;;  %v1109_v19 = vand.u32 8388607, %v1102_v22  ;;  %v1114_v2 = vsel %vm1113_vm8, %v1112_v18, 0  ;;  %v2451_v1 = vadd.s32 4294967169, %v1626_v29 }
 0x126   : > { %v892_v59 = vsel %vm885_vm14, %v888_v47, %v891_v37  ;;  %v769_v49 = vmul.f32 %v768_v45, %v766_v16  ;;  %v1267_v56 = vadd.s32 536870912, %v1266_v61  ;;  %v462_v17 = vrot.slane %v3859_v53, 4 }
 0x127   : > { %v893_v41 = vsel %vm882_vm15, nan, %v892_v59  ;;  %v1116_v3 = vand.u32 31, %v1114_v2  ;;  %v3872_v36 = vand.u32 3, %v779_v40  ;;  %v1622_v8 = vand.u32 2147483647, %v3828_v58 }
 0x128   : > { %1822 = vxpose.xlu1.b32.start [1/3] (short) %v893_v41, 128  ;;  %v770_v51 = vxor.u32 2147483648, %v769_v49  ;;  %v3874_v4 = vshrl.u32 %v1267_v56, 30  ;;  %v1110_v57 = vor.u32 8388608, %v1109_v19  ;;  %v1632_v35 = vadd.s32 1, %v2451_v1 }
 0x129   : > { %v1117_v27 = vsub.s32 32, %v1116_v3  ;;  %v1119_v14 = vshll.u32 %v2811_v24, %v1116_v3  ;;  %v1122_v50 = vshll.u32 %v2812_v26, %v1116_v3  ;;  %v1125_v44 = vshll.u32 %v2813_v28, %v1116_v3 }
 0x12a   : > { %v771_v12 = vsel %vm688_vm0, %v770_v51, %v769_v49  ;;  %v1269_v60 = vshll.u32 %v3874_v4, 30  ;;  %v1115_v0 = vshrl.u32 %v1114_v2, 5  ;;  %v1128_v54 = vshll.u32 %v2814_v30, %v1116_v3 }
 0x12b   : > { %v774_v62 = vsel %vm3820_vm1, %v3589_v9, %v771_v12  ;;  %v1120_v52 = vshrl.u32 %v2812_v26, %v1117_v27  ;;  %v1123_v43 = vshrl.u32 %v2813_v28, %v1117_v27  ;;  %v1126_v11 = vshrl.u32 %v2814_v30, %v1117_v27 }
 0x12c   : > { %2662 = vcosq.f32 %v774_v62  ;;  %v3888_v48 = vsub.s32 %v1266_v61, %v1269_v60  ;;  %v1118_v23 = vshrl.u32 %v2811_v24, %v1117_v27  ;;  %v3895_v33 = vand.u32 8388607, %v1622_v8 }
 0x12d   : > { %2664 = vsinq.f32 %v774_v62  ;;  %v1121_v10 = vor.u32 %v1120_v52, %v1119_v14  ;;  %v1124_v46 = vor.u32 %v1123_v43, %v1122_v50  ;;  %v1127_v38 = vor.u32 %v1126_v11, %v1125_v44 }
 0x12e   : > { %v1272_v6 = vsub.s32 0, %v3888_v48  ;;  %v1129_v29 = vshrl.u32 %v2815_v32, %v1117_v27  ;;  %v1131_v15 = vshll.u32 %v2815_v32, %v1116_v3  ;;  %v1132_v63 = vshrl.u32 %v2816_v39, %v1117_v27 }
 0x12f   : > { %vm1134_vm4 = vcmp.lt.s32.totalorder %v1115_v0, 1  ;;  %v3901_v13 = vshll.u32 %v1110_v57, 8  ;;  %vm1137_vm7 = vcmp.lt.s32.totalorder %v1115_v0, 4  ;;  %vm1633_vm0 = vcmp.gt.s32.totalorder %v1632_v35, 0 }
 0x130   : > { %v2436_v45 = vmin.u32 %v1272_v6, %v3888_v48  ;;  %v1130_v18 = vor.u32 %v1129_v29, %v1128_v54  ;;  %v1133_v21 = vor.u32 %v1132_v63, %v1131_v15  ;;  %vm1135_vm1 = vcmp.lt.s32.totalorder %v1115_v0, 2 }
 0x131   : > { %vm1136_vm2 = vcmp.lt.s32.totalorder %v1115_v0, 3  ;;  %v1139_v40 = vsel %vm1137_vm7, %v1127_v38, 2102212464  ;;  %vm782_vm6 = vcmp.eq.s32.totalorder %v3872_v36, 0  ;;  %v1138_v37 = vsel %vm1134_vm4, %v1118_v23, %v1121_v10 }
 0x132   : > { %v1274_v25 = vclz %v2436_v45  ;;  %v1142_v16 = vsel %vm1134_vm4, %v1121_v10, %v1124_v46  ;;  %v1146_v61 = vsel %vm1134_vm4, %v1124_v46, %v1127_v38  ;;  %vm781_vm9 = vcmp.lt.s32.totalorder %v3872_v36, 2 }
 0x133   : > { %v1140_v47 = vsel %vm1136_vm2, %v1124_v46, %v1139_v40  ;;  %v1143_v19 = vsel %vm1137_vm7, %v1130_v18, 920167782  ;;  %v1147_v2 = vsel %vm1137_vm7, %v1133_v21, 1326507024  ;;  %v1634_v1 = vsel %vm1633_vm0, %v1632_v35, 0 }
 0x134   : > { %vm778_vm10 = vweird.f32 %v3589_v9  ;;  %vm785_vm13 = vcmp.eq.s32.totalorder %v3872_v36, 2  ;;  %v2437_v59 = vadd.s32 4294967294, %v1274_v25  ;;  %v1144_v49 = vsel %vm1136_vm2, %v1127_v38, %v1143_v19 }
 0x135   : > { %v1148_v56 = vsel %vm1136_vm2, %v1130_v18, %v1147_v2  ;;  %v1262_v41 = vadd.s32 %v3842_v55, %v3839_v20  ;;  %v1141_v3 = vsel %vm1135_vm1, %v1138_v37, %v1140_v47  ;;  %v1145_v51 = vsel %vm1135_vm1, %v1142_v16, %v1144_v49 }
 0x136   : > { %v1149_v57 = vsel %vm1135_vm1, %v1146_v61, %v1148_v56  ;;  %vm2438_vm15 = vcmp.lt.s32.totalorder %v2437_v59, 0  ;;  %v1636_v35 = vand.u32 31, %v1634_v1  ;;  %v1630_v20 = vor.u32 8388608, %v3895_v33 }
 0x137   : > { %v3917_v27 = vmul.u32.u64.low %v3901_v13, %v1149_v57  ;;  %v3918_v14 = vmul.u32.u64.high %v3901_v13, %v1149_v57, %v3917_v27  ;;  %v1277_v12 = vsel %vm2438_vm15, 0, %v2437_v59  ;;  %v1157_v43 = vmul.u32 %v3901_v13, %v1141_v3 }
 0x138   : > { %v3921_v60 = vmul.u32.u64.low %v3901_v13, %v1145_v51  ;;  %v3922_v50 = vmul.u32.u64.high %v3901_v13, %v1145_v51, %v3921_v60  ;;  %v1278_v55 = vsub.s32 32, %v1277_v12  ;;  %v1279_v44 = vshll.u32 %v3888_v48, %v1277_v12 }
 0x139   : > { %v1282_v62 = vsub.s32 4294967266, %v1277_v12  ;;  %v1637_v0 = vsub.s32 32, %v1636_v35  ;;  %v2663_v52 = vpop.eup %2662  ;;  %v3928_v11 = vshrl.u32 %v1634_v1, 5  ;;  %v1639_v54 = vshll.u32 %v2811_v24, %v1636_v35 }
 0x13a   : > { %v1642_v23 = vshll.u32 %v2812_v26, %v1636_v35  ;;  %v2665_v10 = vpop.eup %2664  ;;  %v786_v6 = vxor.u32 2147483648, %v2663_v52  ;;  %v1280_v46 = vshrl.u32 %v1262_v41, %v1278_v55  ;;  %v1645_v33 = vshll.u32 %v2813_v28, %v1636_v35 }
 0x13b   : > { %v1283_v38 = vadd.s32 127, %v1282_v62  ;;  %v783_v29 = vxor.u32 2147483648, %v2665_v10  ;;  %vm1208_vm14 = vcmp.lt.s32.totalorder %v3722_v5, 0  ;;  %vm1159_vm12 = vc.u32 %v3918_v14, %v3921_v60 }
 0x13c   : > { %v1160_v48 = vadd.s32 1, %v3922_v50  ;;  %v1648_v15 = vshll.u32 %v2814_v30, %v1636_v35  ;;  %v787_v63 = vsel %vm785_vm13, %v786_v6, %v2665_v10  ;;  %vm3942_vm5 = vcmp.le.f32.partialorder %v1206_v7, 0.7853982 }
 0x13d   : > { %v1281_v45 = vor.u32 %v1280_v46, %v1279_v44  ;;  %v1284_v18 = vshll.u32 %v1283_v38, 23  ;;  %v1640_v21 = vshrl.u32 %v2812_v26, %v1637_v0  ;;  %v784_v40 = vsel %vm782_vm6, %v2663_v52, %v783_v29 }
 0x13e   : > { %v1161_v25 = vsel %vm1159_vm12, %v1160_v48, %v3922_v50  ;;  %v1643_v37 = vshrl.u32 %v2813_v28, %v1637_v0  ;;  %v1646_v16 = vshrl.u32 %v2814_v30, %v1637_v0  ;;  %v788_v61 = vsel %vm781_vm9, %v784_v40, %v787_v63 }
 0x13f   : > { %v1285_v7 = vor.u32 4788187, %v1284_v18  ;;  %v1288_v47 = vcvt.s32.f32 %v1281_v45  ;;  %v1162_v19 = vadd.s32 %v1161_v25, %v1157_v43  ;;  %v789_v2 = vsel %vm778_vm10, nan, %v788_v61 }
 0x140   : > { %v1292_v1 = vsub.s32 4, %v3874_v4  ;;  %v1641_v59 = vor.u32 %v1640_v21, %v1639_v54  ;;  %v1644_v49 = vor.u32 %v1643_v37, %v1642_v23  ;;  %1790 = vxpose.xlu0.b32.start [1/3] (short) %v789_v2, 128  ;;  %v1649_v3 = vshrl.u32 %v2815_v32, %v1637_v0 }
 0x141   : > { %v1286_v56 = vand.u32 2147483647, %v1285_v7  ;;  %v1163_v41 = vadd.s32 536870912, %v1162_v19  ;;  %v1651_v51 = vshll.u32 %v2815_v32, %v1636_v35  ;;  %v1638_v36 = vshrl.u32 %v2811_v24, %v1637_v0 }
 0x142   : > { %v1647_v57 = vor.u32 %v1646_v16, %v1645_v33  ;;  %v1652_v27 = vshrl.u32 %v2816_v39, %v1637_v0  ;;  %vm1654_vm11 = vcmp.lt.s32.totalorder %v3928_v11, 1  ;;  %v1650_v50 = vor.u32 %v1649_v3, %v1648_v15 }
 0x143   : > { %v1289_v9 = vmul.f32 %v1288_v47, %v1286_v56  ;;  %v3962_v12 = vshrl.u32 %v1163_v41, 30  ;;  %vm1657_vm8 = vcmp.lt.s32.totalorder %v3928_v11, 4  ;;  %vm1655_vm4 = vcmp.lt.s32.totalorder %v3928_v11, 2 }
 0x144   : > { %v1653_v55 = vor.u32 %v1652_v27, %v1651_v51  ;;  %vm1656_vm7 = vcmp.lt.s32.totalorder %v3928_v11, 3  ;;  %v1670_v44 = vshll.u32 %v1630_v20, 8  ;;  %v1659_v52 = vsel %vm1657_vm8, %v1647_v57, 2102212464 }
 0x145   : > { %v1290_v35 = vxor.u32 2147483648, %v1289_v9  ;;  %v1165_v62 = vshll.u32 %v3962_v12, 30  ;;  %v1662_v0 = vsel %vm1654_vm11, %v1641_v59, %v1644_v49  ;;  %v1293_v43 = vsel %vm1208_vm14, %v1292_v1, %v3874_v4 }
 0x146   : > { %v1663_v54 = vsel %vm1657_vm8, %v1650_v50, 920167782  ;;  %v1666_v23 = vsel %vm1654_vm11, %v1644_v49, %v1647_v57  ;;  %v1667_v10 = vsel %vm1657_vm8, %v1653_v55, 1326507024  ;;  %v1658_v46 = vsel %vm1654_vm11, %v1638_v36, %v1641_v59 }
 0x147   : > { %v1291_v6 = vsel %vm1208_vm14, %v1290_v35, %v1289_v9  ;;  %v1166_v20 = vsub.s32 %v1162_v19, %v1165_v62  ;;  %v1664_v38 = vsel %vm1656_vm7, %v1647_v57, %v1663_v54  ;;  %v1660_v4 = vsel %vm1656_vm7, %v1644_v49, %v1659_v52 }
 0x148   : > { %v1294_v33 = vsel %vm3942_vm5, %v3722_v5, %v1291_v6  ;;  %v1665_v29 = vsel %vm1655_vm4, %v1662_v0, %v1664_v38  ;;  %v1668_v48 = vsel %vm1656_vm7, %v1650_v50, %v1667_v10  ;;  %v1295_v15 = vsel %vm3942_vm5, 0, %v1293_v43 }
 0x149   : > { %2666 = vcosq.f32 %v1294_v33  ;;  %v1168_v63 = vsub.s32 0, %v1166_v20  ;;  %v1669_v45 = vsel %vm1655_vm4, %v1666_v23, %v1668_v48  ;;  %v1661_v25 = vsel %vm1655_vm4, %v1658_v46, %v1660_v4 }
 0x14a   : > { %2668 = vsinq.f32 %v1294_v33  ;;  %v3994_v18 = vmul.u32.u64.low %v1670_v44, %v1669_v45  ;;  %v3995_v21 = vmul.u32.u64.high %v1670_v44, %v1669_v45, %v3994_v18  ;;  %v1299_v61 = vadd.s32 3, %v1295_v15 }
 0x14b   : > { %v2432_v40 = vmin.u32 %v1168_v63, %v1166_v20  ;;  %v3999_v37 = vmul.u32.u64.low %v1670_v44, %v1665_v29  ;;  %v4000_v16 = vmul.u32.u64.high %v1670_v44, %v1665_v29, %v3999_v37  ;;  %v4008_v13 = vsel %vm406_vm3, %v456_v42, %v462_v17 }
 0x14c   : > { %v1677_v47 = vmul.u32 %v1670_v44, %v1661_v25  ;;  %v1521_v2 = vand.u32 2139095040, %v4008_v13  ;;  %v1300_v1 = vand.u32 3, %v1299_v61  ;;  %v1158_v59 = vadd.s32 %v3921_v60, %v3918_v14 }
 0x14d   : > { %v1170_v7 = vclz %v2432_v40  ;;  %vm1679_vm0 = vc.u32 %v3995_v21, %v3999_v37  ;;  %v1680_v11 = vadd.s32 1, %v4000_v16  ;;  %v1188_v17 = vsub.s32 4, %v3962_v12 }
 0x14e   : > { %v1522_v53 = vshrl.u32 %v1521_v2, 23  ;;  %v1518_v56 = vand.u32 2147483647, %v4008_v13  ;;  %vm1298_vm3 = vweird.f32 %v3722_v5  ;;  %vm1104_vm2 = vcmp.lt.s32.totalorder %v3803_v31, 0 }
 0x14f   : > { %v2433_v19 = vadd.s32 4294967294, %v1170_v7  ;;  %v1681_v34 = vsel %vm1679_vm0, %v1680_v11, %v4000_v16  ;;  %vm1302_vm6 = vcmp.eq.s32.totalorder %v1300_v1, 0  ;;  %vm1305_vm9 = vcmp.eq.s32.totalorder %v1300_v1, 2 }
 0x150   : > { %v1682_v49 = vadd.s32 %v1681_v34, %v1677_v47  ;;  %v2447_v36 = vadd.s32 4294967169, %v1522_v53  ;;  %v1189_v50 = vsel %vm1104_vm2, %v1188_v17, %v3962_v12  ;;  %v1525_v44 = vand.u32 8388607, %v1518_v56 }
 0x151   : > { %vm2434_vm1 = vcmp.lt.s32.totalorder %v2433_v19, 0  ;;  %vm1301_vm13 = vcmp.lt.s32.totalorder %v1300_v1, 2  ;;  %vm4031_vm15 = vcmp.le.f32.partialorder %v1102_v22, 0.7853982  ;;  %v1678_v7 = vadd.s32 %v3999_v37, %v3995_v21 }
 0x152   : > { %v1173_v42 = vsel %vm2434_vm1, 0, %v2433_v19  ;;  %v1683_v57 = vadd.s32 536870912, %v1682_v49  ;;  %v1528_v27 = vadd.s32 1, %v2447_v36  ;;  %v1191_v38 = vsel %vm4031_vm15, 0, %v1189_v50 }
 0x153   : > { %v1174_v41 = vsub.s32 32, %v1173_v42  ;;  %v1175_v3 = vshll.u32 %v1166_v20, %v1173_v42  ;;  %v1178_v51 = vsub.s32 4294967266, %v1173_v42  ;;  %v1526_v15 = vor.u32 8388608, %v1525_v44 }
 0x154   : > { %v4024_v55 = vshrl.u32 %v1683_v57, 30  ;;  %vm1529_vm10 = vcmp.gt.s32.totalorder %v1528_v27, 0  ;;  %v1195_v25 = vadd.s32 3, %v1191_v38  ;;  %vm1854_vm14 = vcmask 195584  }
 0x155   : > { %v1176_v14 = vshrl.u32 %v1158_v59, %v1174_v41  ;;  %v1179_v60 = vadd.s32 127, %v1178_v51  ;;  %v1530_v23 = vsel %vm1529_vm10, %v1528_v27, 0  ;;  %v4057_v53 = vshll.u32 %v1526_v15, 8 }
 0x156   : > { %v2667_v9 = vpop.eup %2666  ;;  %v1685_v54 = vshll.u32 %v4024_v55, 30  ;;  %v1532_v4 = vand.u32 31, %v1530_v23  ;;  %v4044_v45 = vshrl.u32 %v1530_v23, 5  ;;  %v1196_v15 = vand.u32 3, %v1195_v25 }
 0x157   : > { %v2669_v35 = vpop.eup %2668  ;;  %v1306_v62 = vxor.u32 2147483648, %v2667_v9  ;;  %v1177_v52 = vor.u32 %v1176_v14, %v1175_v3  ;;  %v1180_v0 = vshll.u32 %v1179_v60, 23  ;;  %vm4121_vm1 = vcmp.le.f32.partialorder %v1622_v8, 0.7853982 }
 0x158   : > { %v1303_v43 = vxor.u32 2147483648, %v2669_v35  ;;  %v4038_v33 = vsub.s32 %v1682_v49, %v1685_v54  ;;  %v1533_v18 = vsub.s32 32, %v1532_v4  ;;  %v1535_v16 = vshll.u32 %v2811_v24, %v1532_v4 }
 0x159   : > { %v1307_v10 = vsel %vm1305_vm9, %v1306_v62, %v2669_v35  ;;  %v1181_v6 = vor.u32 4788187, %v1180_v0  ;;  %v1184_v20 = vcvt.s32.f32 %v1177_v52  ;;  %v1538_v61 = vshll.u32 %v2812_v26, %v1532_v4 }
 0x15a   : > { %v1304_v46 = vsel %vm1302_vm6, %v2667_v9, %v1303_v43  ;;  %v1688_v63 = vsub.s32 0, %v4038_v33  ;;  %v1536_v5 = vshrl.u32 %v2812_v26, %v1533_v18  ;;  %v1539_v11 = vshrl.u32 %v2813_v28, %v1533_v18 }
 0x15b   : > { %v1308_v29 = vsel %vm1301_vm13, %v1304_v46, %v1307_v10  ;;  %v1182_v48 = vand.u32 2147483647, %v1181_v6  ;;  %v1541_v2 = vshll.u32 %v2813_v28, %v1532_v4  ;;  %v1542_v1 = vshrl.u32 %v2814_v30, %v1533_v18 }
 0x15c   : > { %v1309_v22 = vsel %vm1298_vm3, nan, %v1308_v29  ;;  %v2452_v47 = vmin.u32 %v1688_v63, %v4038_v33  ;;  %v1544_v34 = vshll.u32 %v2814_v30, %v1532_v4  ;;  %vm1550_vm12 = vcmp.lt.s32.totalorder %v4044_v45, 1 }
 0x15d   : > { %1823 = vxpose.xlu1.b32.cont [2/3] (short) %v1309_v22, 128  ;;  %v1185_v40 = vmul.f32 %v1184_v20, %v1182_v48  ;;  %v1534_v26 = vshrl.u32 %v2811_v24, %v1533_v18  ;;  %v1537_v42 = vor.u32 %v1536_v5, %v1535_v16  ;;  %v1540_v17 = vor.u32 %v1539_v11, %v1538_v61 }
 0x15e   : > { %v1690_v59 = vclz %v2452_v47  ;;  %v1545_v49 = vshrl.u32 %v2815_v32, %v1533_v18  ;;  %v1547_v41 = vshll.u32 %v2815_v32, %v1532_v4  ;;  %v1543_v3 = vor.u32 %v1542_v1, %v1541_v2 }
 0x15f   : > { %v1186_v19 = vxor.u32 2147483648, %v1185_v40  ;;  %v1548_v24 = vshrl.u32 %v2816_v39, %v1533_v18  ;;  %vm1551_vm5 = vcmp.lt.s32.totalorder %v4044_v45, 2  ;;  %vm1553_vm8 = vcmp.lt.s32.totalorder %v4044_v45, 4 }
 0x160   : > { %v1774_v21 = vpop.trf.xlu1  ;;  %v2453_v30 = vadd.s32 4294967294, %v1690_v59  ;;  %v1546_v51 = vor.u32 %v1545_v49, %v1544_v34  ;;  %vm1552_vm4 = vcmp.lt.s32.totalorder %v4044_v45, 3  ;;  %v1555_v60 = vsel %vm1553_vm8, %v1543_v3, 2102212464 }
 0x161   : > { %v1187_v37 = vsel %vm1104_vm2, %v1186_v19, %v1185_v40  ;;  %1871 = vst.msk [vmem:[%s4062_s16 + $0x80] sm:$0xff] %vm1854_vm14, %v1774_v21  ;;  %v1549_v14 = vor.u32 %v1548_v24, %v1547_v41  ;;  %v1554_v9 = vsel %vm1550_vm12, %v1534_v26, %v1537_v42  ;;  %v1556_v50 = vsel %vm1552_vm4, %v1540_v17, %v1555_v60 }
 0x162   : > { %v1190_v28 = vsel %vm4031_vm15, %v3803_v31, %v1187_v37  ;;  %vm2454_vm11 = vcmp.lt.s32.totalorder %v2453_v30, 0  ;;  %v1558_v44 = vsel %vm1550_vm12, %v1537_v42, %v1540_v17  ;;  %v1559_v35 = vsel %vm1553_vm8, %v1546_v51, 920167782 }
 0x163   : > { %2670 = vcosq.f32 %v1190_v28  ;;  %v1693_v57 = vsel %vm2454_vm11, 0, %v2453_v30  ;;  %v1562_v62 = vsel %vm1550_vm12, %v1540_v17, %v1543_v3  ;;  %v1560_v43 = vsel %vm1552_vm4, %v1543_v3, %v1559_v35 }
 0x164   : > { %2672 = vsinq.f32 %v1190_v28  ;;  %v1775_v36 = vpop.trf.xlu1  ;;  %v1694_v32 = vsub.s32 32, %v1693_v57  ;;  %v1695_v39 = vshll.u32 %v4038_v33, %v1693_v57  ;;  %v1698_v27 = vsub.s32 4294967266, %v1693_v57 }
 0x165   : > { %1872 = vst.msk [vmem:[%s4062_s16 + $0x88] sm:$0xff] %vm1854_vm14, %v1775_v36  ;;  %v1563_v54 = vsel %vm1553_vm8, %v1549_v14, 1326507024  ;;  %v1561_v10 = vsel %vm1551_vm5, %v1558_v44, %v1560_v43  ;;  %v1557_v46 = vsel %vm1551_vm5, %v1554_v9, %v1556_v50  ;;  %vm1201_vm0 = vcmp.eq.s32.totalorder %v1196_v15, 2 }
 0x166   : > { %v1696_v52 = vshrl.u32 %v1678_v7, %v1694_v32  ;;  %v1699_v0 = vadd.s32 127, %v1698_v27  ;;  %v1564_v12 = vsel %vm1552_vm4, %v1546_v51, %v1563_v54  ;;  %v1573_v45 = vmul.u32 %v4057_v53, %v1557_v46 }
 0x167   : > { %v1565_v38 = vsel %vm1551_vm5, %v1562_v62, %v1564_v12  ;;  %v4109_v29 = vmul.u32.u64.low %v4057_v53, %v1561_v10  ;;  %v4110_v48 = vmul.u32.u64.high %v4057_v53, %v1561_v10, %v4109_v29  ;;  %vm1624_vm3 = vcmp.lt.s32.totalorder %v3828_v58, 0 }
 0x168   : > { %v1776_v23 = vpop.trf.xlu1  ;;  %v1697_v6 = vor.u32 %v1696_v52, %v1695_v39  ;;  %v1700_v20 = vshll.u32 %v1699_v0, 23  ;;  %v4105_v33 = vmul.u32.u64.low %v4057_v53, %v1565_v38  ;;  %v4106_v4 = vmul.u32.u64.high %v4057_v53, %v1565_v38, %v4105_v33 }
 0x169   : > { %1873 = vst.msk [vmem:[%s4062_s16 + $0x90] sm:$0xff] %vm1854_vm14, %v1776_v23  ;;  %v1576_v16 = vadd.s32 1, %v4110_v48  ;;  %vm1198_vm2 = vcmp.eq.s32.totalorder %v1196_v15, 0  ;;  %v1708_v11 = vsub.s32 4, %v4024_v55  ;;  %vm1197_vm6 = vcmp.lt.s32.totalorder %v1196_v15, 2 }
 0x16a   : > { %v1701_v22 = vor.u32 4788187, %v1700_v20  ;;  %v1704_v63 = vcvt.s32.f32 %v1697_v6  ;;  %vm1575_vm7 = vc.u32 %v4106_v4, %v4109_v29  ;;  %vm1194_vm9 = vweird.f32 %v3803_v31 }
 0x16b   : > { %v1577_v2 = vsel %vm1575_vm7, %v1576_v16, %v4110_v48  ;;  %v1709_v17 = vsel %vm1624_vm3, %v1708_v11, %v4024_v55  ;;  %v1574_v0 = vadd.s32 %v4109_v29, %v4106_v4  ;;  %vm1714_vm12 = vweird.f32 %v3828_v58 }
 0x16c   : > { %v1777_v18 = vpop.trf.xlu1  ;;  %v1702_v40 = vand.u32 2147483647, %v1701_v22  ;;  %v1578_v59 = vadd.s32 %v1577_v2, %v1573_v45  ;;  %v1711_v41 = vsel %vm4121_vm1, 0, %v1709_v17  ;;  %vm1520_vm11 = vcmp.lt.s32.totalorder %v4008_v13, 0 }
 0x16d   : > { %1874 = vst.msk [vmem:[%s4062_s16 + $0x98] sm:$0xff] %vm1854_vm14, %v1777_v18  ;;  %v1715_v51 = vadd.s32 3, %v1711_v41  ;;  %vm4184_vm8 = vcmp.le.f32.partialorder %v1518_v56, 0.7853982 }
 0x16e   : > { %v1705_v7 = vmul.f32 %v1704_v63, %v1702_v40  ;;  %v1579_v37 = vadd.s32 536870912, %v1578_v59 }
 0x16f   : > { %v1716_v32 = vand.u32 3, %v1715_v51 }
 0x170   : > { %v2671_v61 = vpop.eup %2670  ;;  %v1778_v47 = vpop.trf.xlu1  ;;  %v1706_v8 = vxor.u32 2147483648, %v1705_v7  ;;  %v4142_v30 = vshrl.u32 %v1579_v37, 30 }
 0x171   : > { %v2673_v5 = vpop.eup %2672  ;;  %v1202_v19 = vxor.u32 2147483648, %v2671_v61  ;;  %1875 = vst.msk [vmem:[%s4062_s16 + $0xa0] sm:$0xff] %vm1854_vm14, %v1778_v47  ;;  %vm1721_vm10 = vcmp.eq.s32.totalorder %v1716_v32, 2  ;;  %vm1718_vm13 = vcmp.eq.s32.totalorder %v1716_v32, 0  ;;  %vm1717_vm5 = vcmp.lt.s32.totalorder %v1716_v32, 2 }
 0x172   : > { %v1199_v1 = vxor.u32 2147483648, %v2673_v5  ;;  %v1707_v21 = vsel %vm1624_vm3, %v1706_v8, %v1705_v7  ;;  %v1581_v55 = vshll.u32 %v4142_v30, 30  ;;  %v1604_v47 = vsub.s32 4, %v4142_v30 }
 0x173   : > { %v1203_v34 = vsel %vm1201_vm0, %v1202_v19, %v2673_v5  ;;  %v1710_v28 = vsel %vm4121_vm1, %v3828_v58, %v1707_v21  ;;  %vm1610_vm1 = vweird.f32 %v4008_v13 }
 0x174   : > { %v1200_v53 = vsel %vm1198_vm2, %v2671_v61, %v1199_v1  ;;  %v1779_v26 = vpop.trf.xlu1  ;;  %2674 = vcosq.f32 %v1710_v28  ;;  %v1582_v24 = vsub.s32 %v1578_v59, %v1581_v55  ;;  %v1605_v8 = vsel %vm1520_vm11, %v1604_v47, %v4142_v30 }
 0x175   : > { %v1204_v42 = vsel %vm1197_vm6, %v1200_v53, %v1203_v34  ;;  %1876 = vst.msk [vmem:[%s4062_s16 + $0xa8] sm:$0xff] %vm1854_vm14, %v1779_v26  ;;  %2676 = vsinq.f32 %v1710_v28  ;;  %v1607_v34 = vsel %vm4184_vm8, 0, %v1605_v8 }
 0x176   : > { %v1205_v31 = vsel %vm1194_vm9, nan, %v1204_v42  ;;  %v1584_v57 = vsub.s32 0, %v1582_v24  ;;  %v1611_v21 = vadd.s32 3, %v1607_v34 }
 0x177   : > { %1791 = vxpose.xlu0.b32.cont [2/3] (short) %v1205_v31, 128  ;;  %v1742_v49 = vpop.trf.xlu0 }
 0x178   : > { %1855 = vst.msk [vmem:[%s4062_s16] sm:$0xff] %vm1854_vm14, %v1742_v49  ;;  %v1780_v3 = vpop.trf.xlu1  ;;  %v2448_v60 = vmin.u32 %v1584_v57, %v1582_v24  ;;  %v1612_v42 = vand.u32 3, %v1611_v21 }
 0x179   : > { %1877 = vst.msk [vmem:[%s4062_s16 + $0xb0] sm:$0xff] %vm1854_vm14, %v1780_v3 }
 0x17a   : > { %v1586_v27 = vclz %v2448_v60  ;;  %vm1617_vm4 = vcmp.eq.s32.totalorder %v1612_v42, 2  ;;  %vm1614_vm7 = vcmp.eq.s32.totalorder %v1612_v42, 0  ;;  %vm1613_vm0 = vcmp.lt.s32.totalorder %v1612_v42, 2 }
 0x17b   : > { %v1743_v36 = vpop.trf.xlu0 }
 0x17c   : > { %1856 = vst.msk [vmem:[%s4062_s16 + $0x8] sm:$0xff] %vm1854_vm14, %v1743_v36  ;;  %v1781_v14 = vpop.trf.xlu1  ;;  %v2449_v50 = vadd.s32 4294967294, %v1586_v27 }
 0x17d   : > { %1878 = vst.msk [vmem:[%s4062_s16 + $0xb8] sm:$0xff] %vm1854_vm14, %v1781_v14 }
 0x17e   : > { %vm2450_vm15 = vcmp.lt.s32.totalorder %v2449_v50, 0 }
 0x17f   : > { %v1744_v39 = vpop.trf.xlu0  ;;  %v1589_v23 = vsel %vm2450_vm15, 0, %v2449_v50 }
 0x180   : > { %1857 = vst.msk [vmem:[%s4062_s16 + $0x10] sm:$0xff] %vm1854_vm14, %v1744_v39  ;;  %v1782_v9 = vpop.trf.xlu1  ;;  %v1590_v12 = vsub.s32 32, %v1589_v23  ;;  %v1591_v6 = vshll.u32 %v1582_v24, %v1589_v23  ;;  %v1594_v20 = vsub.s32 4294967266, %v1589_v23 }
 0x181   : > { %1879 = vst.msk [vmem:[%s4062_s16 + $0xc0] sm:$0xff] %vm1854_vm14, %v1782_v9  ;;  %v2675_v44 = vpop.eup %2674 }
 0x182   : > { %v2677_v62 = vpop.eup %2676  ;;  %v1722_v52 = vxor.u32 2147483648, %v2675_v44  ;;  %v1592_v4 = vshrl.u32 %v1574_v0, %v1590_v12  ;;  %v1595_v29 = vadd.s32 127, %v1594_v20 }
 0x183   : > { %v1745_v35 = vpop.trf.xlu0  ;;  %v1719_v54 = vxor.u32 2147483648, %v2677_v62 }
 0x184   : > { %1858 = vst.msk [vmem:[%s4062_s16 + $0x18] sm:$0xff] %vm1854_vm14, %v1745_v35  ;;  %v1783_v43 = vpop.trf.xlu1  ;;  %v1723_v10 = vsel %vm1721_vm10, %v1722_v52, %v2677_v62  ;;  %v1593_v22 = vor.u32 %v1592_v4, %v1591_v6  ;;  %v1596_v63 = vshll.u32 %v1595_v29, 23 }
 0x185   : > { %1880 = vst.msk [vmem:[%s4062_s16 + $0xc8] sm:$0xff] %vm1854_vm14, %v1783_v43  ;;  %v1720_v46 = vsel %vm1718_vm13, %v2675_v44, %v1719_v54 }
 0x186   : > { %v1724_v33 = vsel %vm1717_vm5, %v1720_v46, %v1723_v10  ;;  %v1597_v40 = vor.u32 4788187, %v1596_v63  ;;  %v1600_v45 = vcvt.s32.f32 %v1593_v22 }
 0x187   : > { %v1746_v38 = vpop.trf.xlu0  ;;  %v1725_v15 = vsel %vm1714_vm12, nan, %v1724_v33 }
 0x188   : > { %1859 = vst.msk [vmem:[%s4062_s16 + $0x20] sm:$0xff] %vm1854_vm14, %v1746_v38  ;;  %v1784_v48 = vpop.trf.xlu1  ;;  %1824 = vxpose.xlu1.b32.end [3/3] (short) %v1725_v15, 128  ;;  %v1598_v61 = vand.u32 2147483647, %v1597_v40 }
 0x189   : > { %1881 = vst.msk [vmem:[%s4062_s16 + $0xd0] sm:$0xff] %vm1854_vm14, %v1784_v48 }
 0x18a   : > { %v1601_v58 = vmul.f32 %v1600_v45, %v1598_v61 }
 0x18b   : > { %v1747_v18 = vpop.trf.xlu0 }
 0x18c   : > { %1860 = vst.msk [vmem:[%s4062_s16 + $0x28] sm:$0xff] %vm1854_vm14, %v1747_v18  ;;  %v1785_v16 = vpop.trf.xlu1  ;;  %v1602_v19 = vxor.u32 2147483648, %v1601_v58 }
 0x18d   : > { %1882 = vst.msk [vmem:[%s4062_s16 + $0xd8] sm:$0xff] %vm1854_vm14, %v1785_v16 }
 0x18e   : > { %v1603_v2 = vsel %vm1520_vm11, %v1602_v19, %v1601_v58 }
 0x18f   : > { %v1748_v25 = vpop.trf.xlu0  ;;  %v1606_v59 = vsel %vm4184_vm8, %v4008_v13, %v1603_v2 }
 0x190   : > { %1861 = vst.msk [vmem:[%s4062_s16 + $0x30] sm:$0xff] %vm1854_vm14, %v1748_v25  ;;  %v1786_v7 = vpop.trf.xlu1  ;;  %2678 = vcosq.f32 %v1606_v59 }
 0x191   : > { %1883 = vst.msk [vmem:[%s4062_s16 + $0xe0] sm:$0xff] %vm1854_vm14, %v1786_v7  ;;  %2680 = vsinq.f32 %v1606_v59 }
 0x193   : > { %v1749_v11 = vpop.trf.xlu0 }
 0x194   : > { %1862 = vst.msk [vmem:[%s4062_s16 + $0x38] sm:$0xff] %vm1854_vm14, %v1749_v11  ;;  %v1787_v1 = vpop.trf.xlu1 }
 0x195   : > { %1884 = vst.msk [vmem:[%s4062_s16 + $0xe8] sm:$0xff] %vm1854_vm14, %v1787_v1 }
 0x197   : > { %v1750_v56 = vpop.trf.xlu0 }
 0x198   : > { %1863 = vst.msk [vmem:[%s4062_s16 + $0x40] sm:$0xff] %vm1854_vm14, %v1750_v56  ;;  %v1788_v53 = vpop.trf.xlu1 }
 0x199   : > { %1885 = vst.msk [vmem:[%s4062_s16 + $0xf0] sm:$0xff] %vm1854_vm14, %v1788_v53 }
 0x19b   : > { %v1751_v37 = vpop.trf.xlu0 }
 0x19c   : > { %1864 = vst.msk [vmem:[%s4062_s16 + $0x48] sm:$0xff] %vm1854_vm14, %v1751_v37  ;;  %v1789_v26 = vpop.trf.xlu1 }
 0x19d   : > { %1886 = vst.msk [vmem:[%s4062_s16 + $0xf8] sm:$0xff] %vm1854_vm14, %v1789_v26  ;;  %v2679_v28 = vpop.eup %2678 }
 0x19e   : > { %v2681_v30 = vpop.eup %2680  ;;  %v1618_v49 = vxor.u32 2147483648, %v2679_v28 }
 0x19f   : > { %v1752_v17 = vpop.trf.xlu0  ;;  %v1615_v41 = vxor.u32 2147483648, %v2681_v30 }
 0x1a0   : > { %1865 = vst.msk [vmem:[%s4062_s16 + $0x50] sm:$0xff] %vm1854_vm14, %v1752_v17  ;;  %v1619_v55 = vsel %vm1617_vm4, %v1618_v49, %v2681_v30 }
 0x1a1   : > { %v1616_v3 = vsel %vm1614_vm7, %v2679_v28, %v1615_v41 }
 0x1a2   : > { %v1620_v51 = vsel %vm1613_vm0, %v1616_v3, %v1619_v55 }
 0x1a3   : > { %v1753_v31 = vpop.trf.xlu0  ;;  %v1621_v36 = vsel %vm1610_vm1, nan, %v1620_v51 }
 0x1a4   : > { %1866 = vst.msk [vmem:[%s4062_s16 + $0x58] sm:$0xff] %vm1854_vm14, %v1753_v31  ;;  %1792 = vxpose.xlu0.b32.end [3/3] (short) %v1621_v36, 128 }
 0x1a7   : > { %v1754_v24 = vpop.trf.xlu0 }
 0x1a8   : > { %1867 = vst.msk [vmem:[%s4062_s16 + $0x60] sm:$0xff] %vm1854_vm14, %v1754_v24 }
 0x1ab   : > { %v1755_v57 = vpop.trf.xlu0 }
 0x1ac   : > { %1868 = vst.msk [vmem:[%s4062_s16 + $0x68] sm:$0xff] %vm1854_vm14, %v1755_v57 }
 0x1af   : > { %v1756_v14 = vpop.trf.xlu0 }
 0x1b0   : > { %1869 = vst.msk [vmem:[%s4062_s16 + $0x70] sm:$0xff] %vm1854_vm14, %v1756_v14 }
 0x1b3   : > { %v1757_v13 = vpop.trf.xlu0 }
 0x1b4   : > { %1870 = vst.msk [vmem:[%s4062_s16 + $0x78] sm:$0xff] %vm1854_vm14, %v1757_v13 }
 0x1fc   : > { %v1838_v60 = vpop.trf.xlu1 }
 0x1fd   : > { %1903 = vst.msk [vmem:[%s4062_s16 + $0x180] sm:$0xff] %vm1854_vm14, %v1838_v60 }
 0x200   : > { %v1839_v32 = vpop.trf.xlu1 }
 0x201   : > { %1904 = vst.msk [vmem:[%s4062_s16 + $0x188] sm:$0xff] %vm1854_vm14, %v1839_v32 }
 0x204   : > { %v1840_v39 = vpop.trf.xlu1 }
 0x205   : > { %1905 = vst.msk [vmem:[%s4062_s16 + $0x190] sm:$0xff] %vm1854_vm14, %v1840_v39 }
 0x208   : > { %v1841_v27 = vpop.trf.xlu1 }
 0x209   : > { %1906 = vst.msk [vmem:[%s4062_s16 + $0x198] sm:$0xff] %vm1854_vm14, %v1841_v27 }
 0x20c   : > { %v1842_v9 = vpop.trf.xlu1 }
 0x20d   : > { %1907 = vst.msk [vmem:[%s4062_s16 + $0x1a0] sm:$0xff] %vm1854_vm14, %v1842_v9 }
 0x210   : > { %v1843_v50 = vpop.trf.xlu1 }
 0x211   : > { %1908 = vst.msk [vmem:[%s4062_s16 + $0x1a8] sm:$0xff] %vm1854_vm14, %v1843_v50 }
 0x214   : > { %v1844_v44 = vpop.trf.xlu1 }
 0x215   : > { %1909 = vst.msk [vmem:[%s4062_s16 + $0x1b0] sm:$0xff] %vm1854_vm14, %v1844_v44 }
 0x218   : > { %v1845_v35 = vpop.trf.xlu1  ;;  %v1806_v62 = vpop.trf.xlu0 }
 0x219   : > { %1910 = vst.msk [vmem:[%s4062_s16 + $0x1b8] sm:$0xff] %vm1854_vm14, %v1845_v35  ;;  %1887 = vst.msk [vmem:[%s4062_s16 + $0x100] sm:$0xff] %vm1854_vm14, %v1806_v62 }
 0x21c   : > { %v1846_v52 = vpop.trf.xlu1  ;;  %v1807_v0 = vpop.trf.xlu0 }
 0x21d   : > { %1911 = vst.msk [vmem:[%s4062_s16 + $0x1c0] sm:$0xff] %vm1854_vm14, %v1846_v52  ;;  %1888 = vst.msk [vmem:[%s4062_s16 + $0x108] sm:$0xff] %vm1854_vm14, %v1807_v0 }
 0x220   : > { %v1847_v43 = vpop.trf.xlu1  ;;  %v1808_v54 = vpop.trf.xlu0 }
 0x221   : > { %1912 = vst.msk [vmem:[%s4062_s16 + $0x1c8] sm:$0xff] %vm1854_vm14, %v1847_v43  ;;  %1889 = vst.msk [vmem:[%s4062_s16 + $0x110] sm:$0xff] %vm1854_vm14, %v1808_v54 }
 0x224   : > { %v1848_v23 = vpop.trf.xlu1  ;;  %v1809_v10 = vpop.trf.xlu0 }
 0x225   : > { %1913 = vst.msk [vmem:[%s4062_s16 + $0x1d0] sm:$0xff] %vm1854_vm14, %v1848_v23  ;;  %1890 = vst.msk [vmem:[%s4062_s16 + $0x118] sm:$0xff] %vm1854_vm14, %v1809_v10 }
 0x228   : > { %v1849_v12 = vpop.trf.xlu1  ;;  %v1810_v6 = vpop.trf.xlu0 }
 0x229   : > { %1914 = vst.msk [vmem:[%s4062_s16 + $0x1d8] sm:$0xff] %vm1854_vm14, %v1849_v12  ;;  %1891 = vst.msk [vmem:[%s4062_s16 + $0x120] sm:$0xff] %vm1854_vm14, %v1810_v6 }
 0x22c   : > { %v1850_v20 = vpop.trf.xlu1  ;;  %v1811_v46 = vpop.trf.xlu0 }
 0x22d   : > { %1915 = vst.msk [vmem:[%s4062_s16 + $0x1e0] sm:$0xff] %vm1854_vm14, %v1850_v20  ;;  %1892 = vst.msk [vmem:[%s4062_s16 + $0x128] sm:$0xff] %vm1854_vm14, %v1811_v46 }
 0x230   : > { %v1851_v38 = vpop.trf.xlu1  ;;  %v1812_v33 = vpop.trf.xlu0 }
 0x231   : > { %1916 = vst.msk [vmem:[%s4062_s16 + $0x1e8] sm:$0xff] %vm1854_vm14, %v1851_v38  ;;  %1893 = vst.msk [vmem:[%s4062_s16 + $0x130] sm:$0xff] %vm1854_vm14, %v1812_v33 }
 0x234   : > { %v1852_v4 = vpop.trf.xlu1  ;;  %v1813_v29 = vpop.trf.xlu0 }
 0x235   : > { %1917 = vst.msk [vmem:[%s4062_s16 + $0x1f0] sm:$0xff] %vm1854_vm14, %v1852_v4  ;;  %1894 = vst.msk [vmem:[%s4062_s16 + $0x138] sm:$0xff] %vm1854_vm14, %v1813_v29 }
 0x238   : > { %v1853_v48 = vpop.trf.xlu1  ;;  %v1814_v15 = vpop.trf.xlu0 }
 0x239   : > { %1918 = vst.msk [vmem:[%s4062_s16 + $0x1f8] sm:$0xff] %vm1854_vm14, %v1853_v48  ;;  %1895 = vst.msk [vmem:[%s4062_s16 + $0x140] sm:$0xff] %vm1854_vm14, %v1814_v15 }
 0x23c   : > { %v1815_v22 = vpop.trf.xlu0 }
 0x23d   : > { %1896 = vst.msk [vmem:[%s4062_s16 + $0x148] sm:$0xff] %vm1854_vm14, %v1815_v22 }
 0x240   : > { %v1816_v63 = vpop.trf.xlu0 }
 0x241   : > { %1897 = vst.msk [vmem:[%s4062_s16 + $0x150] sm:$0xff] %vm1854_vm14, %v1816_v63 }
 0x244   : > { %v1817_v18 = vpop.trf.xlu0 }
 0x245   : > { %1898 = vst.msk [vmem:[%s4062_s16 + $0x158] sm:$0xff] %vm1854_vm14, %v1817_v18 }
 0x248   : > { %v1818_v40 = vpop.trf.xlu0 }
 0x249   : > { %1899 = vst.msk [vmem:[%s4062_s16 + $0x160] sm:$0xff] %vm1854_vm14, %v1818_v40 }
 0x24c   : > { %v1819_v45 = vpop.trf.xlu0 }
 0x24d   : > { %1900 = vst.msk [vmem:[%s4062_s16 + $0x168] sm:$0xff] %vm1854_vm14, %v1819_v45 }
 0x250   : > { %v1820_v16 = vpop.trf.xlu0 }
 0x251   : > { %1901 = vst.msk [vmem:[%s4062_s16 + $0x170] sm:$0xff] %vm1854_vm14, %v1820_v16  ;;  %1925 = sbr.rel (!%p4535_p9) target bundleno = 662 (0x296), region = 32 }
 0x254   : > { %v1821_v61 = vpop.trf.xlu0 }
 0x255   : > { %1902 = vst.msk [vmem:[%s4062_s16 + $0x178] sm:$0xff] %vm1854_vm14, %v1821_v61 }
 0x256   : > { %s4546_s23 = smov (!%p1928_p10, %s1927_s23), 64 }
 0x257   : > { %s2457_s27 = sshll.u32 %s4546_s23, 7 }
 0x258   : > { %p2460_p11 = scmp.eq.s32.totalorder %s2457_s27, 0 }
 0x259   : > { %s4296_s17 = sshrl.u32 (!%p2460_p11), %s4546_s23, 6 }
 0x25a   : > { %1936 = sbr.rel (%p2460_p11) target bundleno = 662 (0x296), region = 36  ;;  %p2461_p12 = scmp.le.s32.totalorder (!%p2460_p11), %s4296_s17, 0 }
 0x25f   : > { %2351 = sbr.rel (%p2461_p12) target bundleno = 645 (0x285), region = 118  ;;  %s4536_s10 = smov (!%p2461_p12), %s4290_s26 }
 0x260   : > { %s4537_s28 = smov (!%p2461_p12), %s4062_s16  ;;  %s4305_s29 = smov (!%p2461_p12), 0  }
 0x261   : > { %s4307_s30 = smov (!%p2461_p12), 0  }
 0x264 LB: >> { %v2125_v25 = vld [vmem:[%s2784_s28] sm:$0xff]  ;;  %v2127_v58 = vld [vmem:[%s2784_s28 + $0x8] sm:$0xff]  ;;  %v2129_v7 = vld [vmem:[%s2784_s28 + $0x10] sm:$0xff]  ;;  %s2253_s2 = sadd.s32 1, %s2788_s29  ;;  %s2119_s30 = sadd.s32 1, %s2792_s30   ;;  %s2792_s30 = sphi %s4307_s30, %s2119_s30   ;;  %s2788_s29 = sphi %s4305_s29, %s4540_s29   ;;  %s2784_s28 = sphi %s4537_s28, %s4539_s28   ;;  %s2780_s10 = sphi %s4536_s10, %s4538_s10  }
 0x265   : >> { %2126 = vst [vmem:[%s2780_s10] sm:$0xff] %v2125_v25  ;;  %2128 = vst [vmem:[%s2780_s10 + $0x8] sm:$0xff] %v2127_v58  ;;  %v2131_v47 = vld [vmem:[%s2784_s28 + $0x18] sm:$0xff]  ;;  %v2133_v5 = vld [vmem:[%s2784_s28 + $0x20] sm:$0xff]  ;;  %p2254_p4 = scmp.ge.s32.totalorder %s2253_s2, %s4296_s17  ;;  %p2118_p5 = scmp.ge.s32.totalorder %s2119_s30, %s4296_s17 }
 0x266   : >> { %2130 = vst [vmem:[%s2780_s10 + $0x10] sm:$0xff] %v2129_v7  ;;  %v2135_v19 = vld [vmem:[%s2784_s28 + $0x28] sm:$0xff]  ;;  %2132 = vst [vmem:[%s2780_s10 + $0x18] sm:$0xff] %v2131_v47  ;;  %v2137_v11 = vld [vmem:[%s2784_s28 + $0x30] sm:$0xff] }
 0x267   : >> { %2134 = vst [vmem:[%s2780_s10 + $0x20] sm:$0xff] %v2133_v5  ;;  %2136 = vst [vmem:[%s2780_s10 + $0x28] sm:$0xff] %v2135_v19  ;;  %v2139_v2 = vld [vmem:[%s2784_s28 + $0x38] sm:$0xff]  ;;  %v2141_v1 = vld [vmem:[%s2784_s28 + $0x40] sm:$0xff]  ;;  %s4548_s2 = smov (%p2254_p4, %s2253_s2), 0 }
 0x268   : >> { %2138 = vst [vmem:[%s2780_s10 + $0x30] sm:$0xff] %v2137_v11  ;;  %2140 = vst [vmem:[%s2780_s10 + $0x38] sm:$0xff] %v2139_v2  ;;  %v2143_v8 = vld [vmem:[%s2784_s28 + $0x48] sm:$0xff]  ;;  %v2145_v59 = vld [vmem:[%s2784_s28 + $0x50] sm:$0xff]  ;;  %s2462_s3 = sshll.u32 %s4548_s2, 9  ;;  %s4540_s29 = smov %s4548_s2 }
 0x269   : >> { %2142 = vst [vmem:[%s2780_s10 + $0x40] sm:$0xff] %v2141_v1  ;;  %v2147_v56 = vld [vmem:[%s2784_s28 + $0x58] sm:$0xff]  ;;  %2144 = vst [vmem:[%s2780_s10 + $0x48] sm:$0xff] %v2143_v8  ;;  %v2149_v34 = vld [vmem:[%s2784_s28 + $0x60] sm:$0xff]  ;;  %s4363_s4 = scalar_lea.vmem %s4062_s16, %s2462_s3 [#allocation4]   ;;  %s4366_s5 = scalar_lea.vmem %s4290_s26, %s2462_s3  }
 0x26a   : >> { %2146 = vst [vmem:[%s2780_s10 + $0x50] sm:$0xff] %v2145_v59  ;;  %2148 = vst [vmem:[%s2780_s10 + $0x58] sm:$0xff] %v2147_v56  ;;  %v2151_v53 = vld [vmem:[%s2784_s28 + $0x68] sm:$0xff]  ;;  %v2153_v21 = vld [vmem:[%s2784_s28 + $0x70] sm:$0xff] }
 0x26b   : >> { %2150 = vst [vmem:[%s2780_s10 + $0x60] sm:$0xff] %v2149_v34  ;;  %2152 = vst [vmem:[%s2780_s10 + $0x68] sm:$0xff] %v2151_v53  ;;  %v2155_v37 = vld [vmem:[%s2784_s28 + $0x78] sm:$0xff]  ;;  %v2157_v26 = vld [vmem:[%s2784_s28 + $0x80] sm:$0xff] }
 0x26c   : >> { %2154 = vst [vmem:[%s2780_s10 + $0x70] sm:$0xff] %v2153_v21  ;;  %v2159_v42 = vld [vmem:[%s2784_s28 + $0x88] sm:$0xff]  ;;  %2156 = vst [vmem:[%s2780_s10 + $0x78] sm:$0xff] %v2155_v37  ;;  %v2161_v17 = vld [vmem:[%s2784_s28 + $0x90] sm:$0xff] }
 0x26d   : >> { %2158 = vst [vmem:[%s2780_s10 + $0x80] sm:$0xff] %v2157_v26  ;;  %2160 = vst [vmem:[%s2780_s10 + $0x88] sm:$0xff] %v2159_v42  ;;  %v2163_v28 = vld [vmem:[%s2784_s28 + $0x98] sm:$0xff]  ;;  %v2165_v31 = vld [vmem:[%s2784_s28 + $0xa0] sm:$0xff] }
 0x26e   : >> { %2162 = vst [vmem:[%s2780_s10 + $0x90] sm:$0xff] %v2161_v17  ;;  %2164 = vst [vmem:[%s2780_s10 + $0x98] sm:$0xff] %v2163_v28  ;;  %v2167_v30 = vld [vmem:[%s2784_s28 + $0xa8] sm:$0xff]  ;;  %v2169_v49 = vld [vmem:[%s2784_s28 + $0xb0] sm:$0xff] }
 0x26f   : >> { %2166 = vst [vmem:[%s2780_s10 + $0xa0] sm:$0xff] %v2165_v31  ;;  %v2171_v41 = vld [vmem:[%s2784_s28 + $0xb8] sm:$0xff]  ;;  %2168 = vst [vmem:[%s2780_s10 + $0xa8] sm:$0xff] %v2167_v30  ;;  %v2173_v55 = vld [vmem:[%s2784_s28 + $0xc0] sm:$0xff] }
 0x270   : >> { %2170 = vst [vmem:[%s2780_s10 + $0xb0] sm:$0xff] %v2169_v49  ;;  %2172 = vst [vmem:[%s2780_s10 + $0xb8] sm:$0xff] %v2171_v41  ;;  %v2175_v3 = vld [vmem:[%s2784_s28 + $0xc8] sm:$0xff]  ;;  %v2177_v24 = vld [vmem:[%s2784_s28 + $0xd0] sm:$0xff] }
 0x271   : >> { %2174 = vst [vmem:[%s2780_s10 + $0xc0] sm:$0xff] %v2173_v55  ;;  %2176 = vst [vmem:[%s2780_s10 + $0xc8] sm:$0xff] %v2175_v3  ;;  %v2179_v51 = vld [vmem:[%s2784_s28 + $0xd8] sm:$0xff]  ;;  %v2181_v36 = vld [vmem:[%s2784_s28 + $0xe0] sm:$0xff] }
 0x272   : >> { %2178 = vst [vmem:[%s2780_s10 + $0xd0] sm:$0xff] %v2177_v24  ;;  %v2183_v57 = vld [vmem:[%s2784_s28 + $0xe8] sm:$0xff]  ;;  %2180 = vst [vmem:[%s2780_s10 + $0xd8] sm:$0xff] %v2179_v51  ;;  %v2185_v14 = vld [vmem:[%s2784_s28 + $0xf0] sm:$0xff] }
 0x273   : >> { %2182 = vst [vmem:[%s2780_s10 + $0xe0] sm:$0xff] %v2181_v36  ;;  %2184 = vst [vmem:[%s2780_s10 + $0xe8] sm:$0xff] %v2183_v57  ;;  %v2187_v13 = vld [vmem:[%s2784_s28 + $0xf8] sm:$0xff]  ;;  %v2189_v60 = vld [vmem:[%s2784_s28 + $0x100] sm:$0xff] }
 0x274   : >> { %2186 = vst [vmem:[%s2780_s10 + $0xf0] sm:$0xff] %v2185_v14  ;;  %2188 = vst [vmem:[%s2780_s10 + $0xf8] sm:$0xff] %v2187_v13  ;;  %v2191_v32 = vld [vmem:[%s2784_s28 + $0x108] sm:$0xff]  ;;  %v2193_v39 = vld [vmem:[%s2784_s28 + $0x110] sm:$0xff] }
 0x275   : >> { %2190 = vst [vmem:[%s2780_s10 + $0x100] sm:$0xff] %v2189_v60  ;;  %v2195_v27 = vld [vmem:[%s2784_s28 + $0x118] sm:$0xff]  ;;  %2192 = vst [vmem:[%s2780_s10 + $0x108] sm:$0xff] %v2191_v32  ;;  %v2197_v9 = vld [vmem:[%s2784_s28 + $0x120] sm:$0xff] }
 0x276   : >> { %2194 = vst [vmem:[%s2780_s10 + $0x110] sm:$0xff] %v2193_v39  ;;  %2196 = vst [vmem:[%s2780_s10 + $0x118] sm:$0xff] %v2195_v27  ;;  %v2199_v50 = vld [vmem:[%s2784_s28 + $0x128] sm:$0xff]  ;;  %v2201_v44 = vld [vmem:[%s2784_s28 + $0x130] sm:$0xff] }
 0x277   : >> { %2198 = vst [vmem:[%s2780_s10 + $0x120] sm:$0xff] %v2197_v9  ;;  %2200 = vst [vmem:[%s2780_s10 + $0x128] sm:$0xff] %v2199_v50  ;;  %v2203_v35 = vld [vmem:[%s2784_s28 + $0x138] sm:$0xff]  ;;  %v2205_v62 = vld [vmem:[%s2784_s28 + $0x140] sm:$0xff] }
 0x278   : >> { %2202 = vst [vmem:[%s2780_s10 + $0x130] sm:$0xff] %v2201_v44  ;;  %v2207_v52 = vld [vmem:[%s2784_s28 + $0x148] sm:$0xff]  ;;  %2204 = vst [vmem:[%s2780_s10 + $0x138] sm:$0xff] %v2203_v35  ;;  %v2209_v0 = vld [vmem:[%s2784_s28 + $0x150] sm:$0xff] }
 0x279   : >> { %2206 = vst [vmem:[%s2780_s10 + $0x140] sm:$0xff] %v2205_v62  ;;  %2208 = vst [vmem:[%s2780_s10 + $0x148] sm:$0xff] %v2207_v52  ;;  %v2211_v43 = vld [vmem:[%s2784_s28 + $0x158] sm:$0xff]  ;;  %v2213_v54 = vld [vmem:[%s2784_s28 + $0x160] sm:$0xff] }
 0x27a   : >> { %2210 = vst [vmem:[%s2780_s10 + $0x150] sm:$0xff] %v2209_v0  ;;  %2212 = vst [vmem:[%s2780_s10 + $0x158] sm:$0xff] %v2211_v43  ;;  %v2215_v23 = vld [vmem:[%s2784_s28 + $0x168] sm:$0xff]  ;;  %v2217_v10 = vld [vmem:[%s2784_s28 + $0x170] sm:$0xff] }
 0x27b   : >> { %2214 = vst [vmem:[%s2780_s10 + $0x160] sm:$0xff] %v2213_v54  ;;  %v2219_v12 = vld [vmem:[%s2784_s28 + $0x178] sm:$0xff]  ;;  %2216 = vst [vmem:[%s2780_s10 + $0x168] sm:$0xff] %v2215_v23  ;;  %v2221_v6 = vld [vmem:[%s2784_s28 + $0x180] sm:$0xff] }
 0x27c   : >> { %2218 = vst [vmem:[%s2780_s10 + $0x170] sm:$0xff] %v2217_v10  ;;  %2220 = vst [vmem:[%s2780_s10 + $0x178] sm:$0xff] %v2219_v12  ;;  %v2223_v20 = vld [vmem:[%s2784_s28 + $0x188] sm:$0xff]  ;;  %v2225_v46 = vld [vmem:[%s2784_s28 + $0x190] sm:$0xff] }
 0x27d   : >> { %2222 = vst [vmem:[%s2780_s10 + $0x180] sm:$0xff] %v2221_v6  ;;  %2224 = vst [vmem:[%s2780_s10 + $0x188] sm:$0xff] %v2223_v20  ;;  %v2227_v38 = vld [vmem:[%s2784_s28 + $0x198] sm:$0xff]  ;;  %v2229_v33 = vld [vmem:[%s2784_s28 + $0x1a0] sm:$0xff] }
 0x27e   : >> { %2226 = vst [vmem:[%s2780_s10 + $0x190] sm:$0xff] %v2225_v46  ;;  %v2231_v4 = vld [vmem:[%s2784_s28 + $0x1a8] sm:$0xff]  ;;  %2228 = vst [vmem:[%s2780_s10 + $0x198] sm:$0xff] %v2227_v38  ;;  %v2233_v29 = vld [vmem:[%s2784_s28 + $0x1b0] sm:$0xff] }
 0x27f   : >> { %2230 = vst [vmem:[%s2780_s10 + $0x1a0] sm:$0xff] %v2229_v33  ;;  %2232 = vst [vmem:[%s2780_s10 + $0x1a8] sm:$0xff] %v2231_v4  ;;  %v2235_v48 = vld [vmem:[%s2784_s28 + $0x1b8] sm:$0xff]  ;;  %v2237_v15 = vld [vmem:[%s2784_s28 + $0x1c0] sm:$0xff] }
 0x280   : >> { %2234 = vst [vmem:[%s2780_s10 + $0x1b0] sm:$0xff] %v2233_v29  ;;  %2236 = vst [vmem:[%s2780_s10 + $0x1b8] sm:$0xff] %v2235_v48  ;;  %v2239_v22 = vld [vmem:[%s2784_s28 + $0x1c8] sm:$0xff]  ;;  %v2241_v63 = vld [vmem:[%s2784_s28 + $0x1d0] sm:$0xff]  ;;  %2121 = sbr.rel (!%p2118_p5) target bundleno = 612 (0x264), region = 124 }
 0x281   : >> { %2238 = vst [vmem:[%s2780_s10 + $0x1c0] sm:$0xff] %v2237_v15  ;;  %v2243_v18 = vld [vmem:[%s2784_s28 + $0x1d8] sm:$0xff]  ;;  %2240 = vst [vmem:[%s2780_s10 + $0x1c8] sm:$0xff] %v2239_v22  ;;  %v2245_v40 = vld [vmem:[%s2784_s28 + $0x1e0] sm:$0xff] }
 0x282   : >> { %2242 = vst [vmem:[%s2780_s10 + $0x1d0] sm:$0xff] %v2241_v63  ;;  %2244 = vst [vmem:[%s2780_s10 + $0x1d8] sm:$0xff] %v2243_v18  ;;  %v2247_v45 = vld [vmem:[%s2784_s28 + $0x1e8] sm:$0xff]  ;;  %v2249_v16 = vld [vmem:[%s2784_s28 + $0x1f0] sm:$0xff] }
 0x283   : >> { %2246 = vst [vmem:[%s2780_s10 + $0x1e0] sm:$0xff] %v2245_v40  ;;  %2248 = vst [vmem:[%s2780_s10 + $0x1e8] sm:$0xff] %v2247_v45  ;;  %v2251_v61 = vld [vmem:[%s2784_s28 + $0x1f8] sm:$0xff]  ;;  %s4539_s28 = smov %s4363_s4 }
 0x284   : >> { %2250 = vst [vmem:[%s2780_s10 + $0x1f0] sm:$0xff] %v2249_v16  ;;  %2252 = vst [vmem:[%s2780_s10 + $0x1f8] sm:$0xff] %v2251_v61  ;;  %s4538_s10 = smov %s4366_s5 }
 0x285 PF: > { %s4471_s6 = sand.u32 63, %s4546_s23   ;;  %s2474_s12 = sshll.u32 %s4296_s17, 9 }
 0x286   : > { %s2264_s13 = scalar_lea.vmem %s4062_s16, %s2474_s12 [#allocation4]   ;;  %s2266_s15 = scalar_lea.vmem %s4290_s26, %s2474_s12  }
 0x287   : > { %p2467_p6 = scmp.le.s32.totalorder %s4471_s6, 0 }
 0x288   : > { %s2794_s18 = smov (!%p2467_p6), %s2266_s15   ;;  %s2798_s19 = smov (!%p2467_p6), %s2264_s13  }
 0x289   : > { %2365 = sbr.rel (%p2467_p6) target bundleno = 662 (0x296), region = 129  ;;  %s2802_s20 = smov (!%p2467_p6), 0  }
 0x28a   : > { %s2806_s9 = smov (!%p2467_p6), 0  }
 0x28e LB: >> { %v2276_v25 = vld [vmem:[%s2800_s19] sm:$0xff]  ;;  %s2278_s21 = sadd.s32 1, %s2804_s20  ;;  %s2270_s9 = sadd.s32 1, %s2808_s9   ;;  %s2808_s9 = sphi %s2806_s9, %s2270_s9   ;;  %s2804_s20 = sphi %s2802_s20, %s2803_s20   ;;  %s2800_s19 = sphi %s2798_s19, %s2283_s19   ;;  %s2796_s18 = sphi %s2794_s18, %s2284_s18  }
 0x28f   : >> { %2277 = vst [vmem:[%s2796_s18] sm:$0xff] %v2276_v25  ;;  %p2279_p8 = scmp.ge.s32.totalorder %s2278_s21, %s4471_s6  ;;  %p2269_p13 = scmp.ge.s32.totalorder %s2270_s9, %s4471_s6 }
 0x291   : >> { %s4550_s21 = smov (%p2279_p8, %s2278_s21), 0  ;;  %2272 = sbr.rel (!%p2269_p13) target bundleno = 654 (0x28e), region = 135 }
 0x292   : >> { %s2468_s16 = sshll.u32 %s4550_s21, 3  ;;  %s2803_s20 = smov %s4550_s21  }
 0x293   : >> { %s2283_s19 = scalar_lea.vmem %s2264_s13, %s2468_s16 [#allocation4]   ;;  %s2284_s18 = scalar_lea.vmem %s2266_s15, %s2468_s16  }
 0x296 PF: > { %p11_p1 = scmp.ge.s32.totalorder %s2849_s11, 4   ;;  %s4541_s6 = smov %s2768_s7 }
 0x297   : > { %s4542_s7 = smov %s2772_s8  ;;  %s4543_s8 = smov %s2859_s14 }
 0x298   : > { %s4544_s9 = smov %s2849_s11  ;;  %13 = sbr.rel (!%p11_p1) target bundleno = 3 (0x3), region = 146 }
 0x29d   :  { %2300 = vsyncpa [#allocation3], 1 }
 0x29e   :  { %2302 = vsyncpa [#allocation3 + $0x1], 1 }

</bundles_post_ra>
